<compile_context>
chip_gen: v6e
topology: v6e:2x2x1
jax: 0.10.0
libtpu: 0.0.40
codegen_flags: <defaults>
</compile_context>

<pallas_src>
import jax
import jax.numpy as jnp
from jax import lax
from jax.experimental import pallas as pl
from jax.experimental.pallas import tpu as pltpu

KSIZE = 7
PAD = 3
LANE = 128
_UNROLL_C_LIMIT = 32          # fully unroll channel loops at or below this C


def _tree_reduce(terms, op):
    terms = list(terms)
    while len(terms) > 1:
        nxt = [op(terms[i], terms[i + 1]) for i in range(0, len(terms) - 1, 2)]
        if len(terms) % 2:
            nxt.append(terms[-1])
        terms = nxt
    return terms[0]


def _stream_sum_max(x_ref, n_ch):
    """Fused single-pass channel sum & max streamed from x_ref[:, c, :].

    Never materializes the whole (nb, C, HWp) block as one value; uses up to
    four independent accumulator chains (combined by a tree at the end) so the
    length-C vadd/vmax dependency chain is spread over the 4 VALU slots.
    """
    G = min(4, n_ch)
    sums, maxs = [], []
    for g in range(G):
        v = x_ref[:, g, :].astype(jnp.float32)
        sums.append(v)
        maxs.append(v)
    if n_ch <= _UNROLL_C_LIMIT:
        for c in range(G, n_ch):
            v = x_ref[:, c, :].astype(jnp.float32)
            g = c % G
            sums[g] = sums[g] + v
            maxs[g] = jnp.maximum(maxs[g], v)
    else:
        n_groups = n_ch // G                          # >= 1 full groups of G

        def body(i, carry):
            s, m = carry
            base = i * G
            s2, m2 = [], []
            for g in range(G):
                v = x_ref[:, base + g, :].astype(jnp.float32)
                s2.append(s[g] + v)
                m2.append(jnp.maximum(m[g], v))
            return tuple(s2), tuple(m2)

        s, m = lax.fori_loop(1, n_groups, body, (tuple(sums), tuple(maxs)),
                             unroll=2)
        sums, maxs = list(s), list(m)
        for c in range(n_groups * G, n_ch):            # remainder channels
            v = x_ref[:, c, :].astype(jnp.float32)
            g = c % G
            sums[g] = sums[g] + v
            maxs[g] = jnp.maximum(maxs[g], v)
    return (_tree_reduce(sums, lambda a, b: a + b),
            _tree_reduce(maxs, jnp.maximum))


def _apply_attention(x_ref, o_ref, att, n_ch):
    """o[:, c, :] = x[:, c, :] * att, streamed one channel at a time so the x
    block is never live across the conv phase; output stays lane-dense
    (unmasked vst) and vld/vmul/vst interleave."""
    def one(c):
        o_ref[:, c, :] = (x_ref[:, c, :].astype(jnp.float32) * att
                          ).astype(o_ref.dtype)

    if n_ch <= _UNROLL_C_LIMIT:
        for c in range(n_ch):
            one(c)
    else:
        def body(c, carry):
            one(c)
            return carry
        lax.fori_loop(0, n_ch, body, 0, unroll=4)


def _flat_conv_sigmoid(w_ref, m_ref, pad_ref, x_mean, x_max, nb, HWp, W):
    """sigmoid(7x7 conv) of the [mean, max] maps in the flat (lane-dense)
    layout, using a flat zero-padded scratch row plus per-kw column masks to
    reproduce exact 2-D zero padding.

    Taps are sliced directly from the VMEM scratch ref (no whole-scratch SSA
    value), so the scheduler interleaves the vlds with the vmul/vadd work.
    """
    L = PAD * W + PAD
    # Zero only the tiny pad border strips every step (cheap; safe under
    # megacore "parallel" sharding where each core has its own scratch).
    zpad = jnp.zeros((2, nb, L), jnp.float32)
    pad_ref[:, :, 0:L] = zpad
    pad_ref[:, :, L + HWp:L + HWp + L] = zpad
    pad_ref[0, :, L:L + HWp] = x_mean
    pad_ref[1, :, L:L + HWp] = x_max

    # out[i] = sum_kw mask_kw[i] * sum_{c,kh} W[c,kh,kw] * padded[c, i+kh*W+kw]
    # Row overflow lands in the flat zero pad; column overflow is removed by
    # the per-kw masks -> exactly the 2-D zero-padded convolution.
    # (Micro-opt if a small-C config ever shows up XLU-bound: derive the 7 kw
    #  taps of each (c, kh) row with one load + pltpu.roll, or im2col + MXU.)
    kw_terms = []
    for kw in range(KSIZE):
        parts = [None, None]          # two independent accumulator chains
        for c in range(2):
            for kh in range(KSIZE):
                wv = w_ref[c * KSIZE * KSIZE + kh * KSIZE + kw]
                off = kh * W + kw
                t = wv * pad_ref[c, :, off:off + HWp]         # (nb, HWp)
                p = kh % 2
                parts[p] = t if parts[p] is None else parts[p] + t
        kw_terms.append(m_ref[kw:kw + 1, :] * (parts[0] + parts[1]))
    conv = _tree_reduce(kw_terms, lambda a, b: a + b)          # (nb, HWp)
    return jax.nn.sigmoid(conv)


def _make_fused_kernel(C, HWp, W):
    """Single-pass kernel: whole (nb, C, HWp) image slab per grid step."""

    def kernel(w_ref, m_ref, x_ref, o_ref, pad_ref):
        nb = x_ref.shape[0]
        x_sum, x_max = _stream_sum_max(x_ref, C)
        att = _flat_conv_sigmoid(w_ref, m_ref, pad_ref,
                                 x_sum * (1.0 / C), x_max, nb, HWp, W)
        _apply_attention(x_ref, o_ref, att, C)

    return kernel


def _make_reduce_kernel(C_total, tc, HWp, W):
    """C-tiled pass 1: accumulate channel sum/max, emit att at the last tile."""

    def kernel(w_ref, m_ref, x_ref, att_ref, sum_ref, max_ref, pad_ref):
        nb = x_ref.shape[0]
        ci = pl.program_id(1)

        @pl.when(ci == 0)
        def _():
            sum_ref[...] = jnp.zeros_like(sum_ref)
            max_ref[...] = jnp.full_like(max_ref, -jnp.inf)

        ps, pm = _stream_sum_max(x_ref, tc)
        sum_ref[...] = sum_ref[...] + ps
        max_ref[...] = jnp.maximum(max_ref[...], pm)

        @pl.when(ci == pl.num_programs(1) - 1)
        def _():
            att_ref[:, 0, :] = _flat_conv_sigmoid(
                w_ref, m_ref, pad_ref,
                sum_ref[...] * (1.0 / C_total), max_ref[...], nb, HWp, W)

    return kernel


def _make_apply_kernel(tc):
    """C-tiled pass 2: out = x * att."""

    def kernel(x_ref, att_ref, o_ref):
        att = att_ref[:, 0, :]                        # (nb, HWp) f32, small
        _apply_attention(x_ref, o_ref, att, tc)

    return kernel


def _tpu_vmem_and_cores():
    """(physical VMEM bytes per core, TensorCores per device) w/ fallbacks."""
    vmem = 64 << 20                                   # conservative (v7x)
    try:
        info = pltpu.get_tpu_info()
        vmem = int(getattr(info, "vmem_capacity_bytes", vmem) or vmem)
    except Exception:
        pass
    cores = 1
    try:
        kind = jax.devices()[0].device_kind.lower()
        if "v7" in kind:
            cores = 2                                 # 2 TCs per chip on v7x
    except Exception:
        pass
    return vmem, cores


def sam_forward(x, w, *, block_budget_bytes=None, force_ctiled=False,
                max_channel_tile=None):
    """SAM forward pass. x: (N, C, H, W); w: (1, 2, 7, 7) OIHW, bias=False."""
    N, C, H, W = x.shape
    HW = H * W
    HWp = ((HW + LANE - 1) // LANE) * LANE
    L = PAD * W + PAD
    itemsize = jnp.dtype(x.dtype).itemsize

    vmem_bytes, n_cores = _tpu_vmem_and_cores()
    vmem_cap = int(vmem_bytes * 0.85)                 # leave compiler headroom
    if block_budget_bytes is None:
        # ~VMEM/10 per block: 4x double-buffered blocks + masks + scratch fit
        # comfortably on 64 MiB (v7x) and 128 MiB (v5e/v6e) parts.
        block_budget_bytes = max(1 << 20, vmem_bytes // 10)

    # Lane-dense flat view; zero-pad the spatial axis to a multiple of 128 so
    # every big load/store is a full unmasked vreg.  Padded tail positions
    # hold zeros -> mean = max = 0 there, matching the conv's zero padding.
    x_flat = x.reshape(N, C, HW)
    if HWp != HW:
        x_flat = jnp.pad(x_flat, ((0, 0), (0, 0), (0, HWp - HW)))
    w_flat = w.reshape(-1).astype(jnp.float32)        # (98,) scalars -> SMEM

    # Per-kw column-validity masks: 1.0 where 0 <= (i % W) + (kw - 3) < W and
    # i is a real (non-padded) output position.
    col = jnp.arange(HWp, dtype=jnp.int32) % W
    real = jnp.arange(HWp, dtype=jnp.int32) < HW
    mask_arr = jnp.stack(
        [(real & (col + (kw - PAD) >= 0) & (col + (kw - PAD) < W))
         .astype(jnp.float32) for kw in range(KSIZE)], axis=0)   # (7, HWp)

    img_bytes = C * HWp * itemsize
    single_pass = (not force_ctiled) and (img_bytes <= block_budget_bytes)

    if single_pass:
        # Images per grid step: driven by the VMEM budget alone on single-TC
        # parts; on multi-TC parts keep the grid length a multiple of the core
        # count so both TensorCores get equal work.
        nb = max(1, min(N, block_budget_bytes // max(1, img_bytes)))
        while N % nb:
            nb -= 1
        if n_cores > 1:
            while nb > 1 and (N // nb) % n_cores:
                nb -= 1
                while N % nb:
                    nb -= 1

        block_bytes = nb * C * HWp * itemsize
        scratch_bytes = 2 * nb * (HWp + 2 * L) * 4
        mask_bytes = 2 * KSIZE * HWp * 4
        need = 4 * block_bytes + mask_bytes + scratch_bytes + (4 << 20)
        vmem_limit = int(min(vmem_cap, max(32 << 20, need)))

        cost = pl.CostEstimate(
            flops=3 * N * C * HWp + 220 * N * HWp,
            transcendentals=N * HWp,
            bytes_accessed=2 * N * C * HWp * itemsize)

        out_flat = pl.pallas_call(
            _make_fused_kernel(C, HWp, W),
            out_shape=jax.ShapeDtypeStruct((N, C, HWp), x.dtype),
            grid_spec=pltpu.PrefetchScalarGridSpec(
                num_scalar_prefetch=0,
                grid=(N // nb,),
                in_specs=[
                    pl.BlockSpec(memory_space=pltpu.MemorySpace.SMEM),   # w
                    pl.BlockSpec((KSIZE, HWp), lambda n: (0, 0)),        # masks
                    pl.BlockSpec((nb, C, HWp), lambda n: (n, 0, 0)),     # x
                ],
                out_specs=pl.BlockSpec((nb, C, HWp), lambda n: (n, 0, 0)),
                scratch_shapes=[pltpu.VMEM((2, nb, HWp + 2 * L), jnp.float32)],
            ),
            compiler_params=pltpu.CompilerParams(
                dimension_semantics=("parallel",),
                vmem_limit_bytes=vmem_limit),
            cost_estimate=cost,
        )(w_flat, mask_arr, x_flat)
    else:
        # ---- C-tiled two-pass path (large C*H*W per image, e.g. on v7x) ----
        # Pass 1 reduces over C tiles into the attention map; pass 2 applies
        # it.  ~1.5x HBM traffic vs the fused path, but keeps blocks small and
        # fully double-buffered instead of stalling the DMA pipeline.
        nb = 1
        cap = max(1, block_budget_bytes // max(1, HWp * itemsize))
        if max_channel_tile is not None:
            cap = min(cap, int(max_channel_tile))
        divisors = [d for d in range(1, C + 1) if C % d == 0]
        aligned = [d for d in divisors if d <= cap and (d % 8 == 0 or d == C)]
        anyfit = [d for d in divisors if d <= cap]
        tc = aligned[-1] if aligned else anyfit[-1]
        n_ct = C // tc

        block_bytes = nb * tc * HWp * itemsize
        scratch_bytes = 2 * nb * HWp * 4 + 2 * nb * (HWp + 2 * L) * 4
        mask_bytes = 2 * KSIZE * HWp * 4
        att_bytes = 2 * nb * HWp * 4
        need1 = 4 * block_bytes + mask_bytes + scratch_bytes + att_bytes + (4 << 20)
        vmem_limit1 = int(min(vmem_cap, max(32 << 20, need1)))

        att = pl.pallas_call(
            _make_reduce_kernel(C, tc, HWp, W),
            out_shape=jax.ShapeDtypeStruct((N, 1, HWp), jnp.float32),
            grid_spec=pltpu.PrefetchScalarGridSpec(
                num_scalar_prefetch=0,
                grid=(N, n_ct),
                in_specs=[
                    pl.BlockSpec(memory_space=pltpu.MemorySpace.SMEM),   # w
                    pl.BlockSpec((KSIZE, HWp), lambda n, c: (0, 0)),     # masks
                    pl.BlockSpec((nb, tc, HWp), lambda n, c: (n, c, 0)),
                ],
                out_specs=pl.BlockSpec((nb, 1, HWp), lambda n, c: (n, 0, 0)),
                scratch_shapes=[
                    pltpu.VMEM((nb, HWp), jnp.float32),      # running sum
                    pltpu.VMEM((nb, HWp), jnp.float32),      # running max
                    pltpu.VMEM((2, nb, HWp + 2 * L), jnp.float32),
                ],
            ),
            compiler_params=pltpu.CompilerParams(
                dimension_semantics=("parallel", "arbitrary"),
                vmem_limit_bytes=vmem_limit1),
            cost_estimate=pl.CostEstimate(
                flops=2 * N * C * HWp + 220 * N * HWp,
                transcendentals=N * HWp,
                bytes_accessed=N * C * HWp * itemsize + N * HWp * 4),
        )(w_flat, mask_arr, x_flat)

        need2 = 4 * block_bytes + att_bytes + (4 << 20)
        vmem_limit2 = int(min(vmem_cap, max(32 << 20, need2)))

        out_flat = pl.pallas_call(
            _make_apply_kernel(tc),
            out_shape=jax.ShapeDtypeStruct((N, C, HWp), x.dtype),
            grid_spec=pltpu.PrefetchScalarGridSpec(
                num_scalar_prefetch=0,
                grid=(N, n_ct),
                in_specs=[
                    pl.BlockSpec((nb, tc, HWp), lambda n, c: (n, c, 0)),
                    pl.BlockSpec((nb, 1, HWp), lambda n, c: (n, 0, 0)),
                ],
                out_specs=pl.BlockSpec((nb, tc, HWp), lambda n, c: (n, c, 0)),
            ),
            compiler_params=pltpu.CompilerParams(
                dimension_semantics=("parallel", "parallel"),
                vmem_limit_bytes=vmem_limit2),
            cost_estimate=pl.CostEstimate(
                flops=N * C * HWp,
                transcendentals=0,
                bytes_accessed=(2 * N * C * HWp * itemsize
                                + N * n_ct * HWp * 4)),
        )(x_flat, att)

    if HWp != HW:
        out_flat = out_flat[:, :, :HW]
    return out_flat.reshape(N, C, H, W)


def sam_reference(x, w):
    """Pure-JAX reference matching the PyTorch forward exactly."""
    x1 = jnp.mean(x, axis=1, keepdims=True)
    x2 = jnp.max(x, axis=1, keepdims=True)
    feats = jnp.concatenate([x1, x2], axis=1)
    conv = lax.conv_general_dilated(
        feats, w, window_strides=(1, 1), padding=((PAD, PAD), (PAD, PAD)),
        dimension_numbers=("NCHW", "OIHW", "NCHW"))
    return x * jax.nn.sigmoid(conv)


if __name__ == "__main__":
    key = jax.random.PRNGKey(0)

    def run_case(N, C, H, W, case, **kwargs):
        kx, kw_ = jax.random.split(jax.random.fold_in(key, case))
        x = jax.random.normal(kx, (N, C, H, W), dtype=jnp.float32)
        fan_in = 2 * KSIZE * KSIZE
        w = jax.random.normal(kw_, (1, 2, KSIZE, KSIZE),
                              dtype=jnp.float32) / (fan_in ** 0.5)
        out = jax.block_until_ready(sam_forward(x, w, **kwargs))
        ref = sam_reference(x, w)
        assert out.shape == x.shape and out.dtype == x.dtype
        err = float(jnp.max(jnp.abs(out - ref)))
        assert jnp.allclose(out, ref, atol=2e-4, rtol=2e-4), (N, C, H, W, err)

    # Main (fused single-pass) path: lane-dense HW, C handled in one block.
    run_case(2, 4, 16, 16, 1)
    # HW not a multiple of 128 (12*12 = 144 -> padded to 256) + C % 4 != 0.
    run_case(2, 6, 12, 12, 2)
    # Forced C-tiled two-pass path (what very large C*H*W images use on v7x).
    run_case(2, 16, 16, 16, 3, force_ctiled=True, max_channel_tile=8)

    print("KERNEL_OK")
</pallas_src>

<mosaic_0001>
module attributes {stable_mosaic.version = 11 : i64} {
  func.func @kernel(%arg0: i32, %arg1: memref<98xf32, #tpu.memory_space<smem>>, %arg2: memref<7x256xf32, #tpu.memory_space<vmem>>, %arg3: memref<2x4x256xf32, #tpu.memory_space<vmem>>, %arg4: memref<2x4x256xf32, #tpu.memory_space<vmem>>, %arg5: memref<2x2x358xf32, #tpu.memory_space<vmem>>) attributes {dimension_semantics = [#tpu.dimension_semantics<parallel>], iteration_bounds = array<i64: 1>, scalar_prefetch = 0 : i64, scratch_operands = 1 : i64, tpu.core_type = #tpu.core_type<tc>, window_params = [{transform_indices = @transform_0, window_bounds = array<i64: 98>}, {pipeline_mode = #tpu.pipeline_mode<synchronous>, transform_indices = @transform_1, window_bounds = array<i64: 7, 256>}, {transform_indices = @transform_2, window_bounds = array<i64: 2, 4, 256>}, {transform_indices = @transform_3, window_bounds = array<i64: 2, 4, 256>}]} {
    %c0 = arith.constant 0 : index
    %c0_0 = arith.constant 0 : index
    %c0_1 = arith.constant 0 : index
    %0 = vector.load %arg3[%c0, %c0_0, %c0_1] : memref<2x4x256xf32, #tpu.memory_space<vmem>>, vector<2x1x256xf32>
    %1 = vector.shape_cast %0 : vector<2x1x256xf32> to vector<2x256xf32>
    %c0_2 = arith.constant 0 : index
    %c1 = arith.constant 1 : index
    %c0_3 = arith.constant 0 : index
    %2 = vector.load %arg3[%c0_2, %c1, %c0_3] : memref<2x4x256xf32, #tpu.memory_space<vmem>>, vector<2x1x256xf32>
    %3 = vector.shape_cast %2 : vector<2x1x256xf32> to vector<2x256xf32>
    %c0_4 = arith.constant 0 : index
    %c2 = arith.constant 2 : index
    %c0_5 = arith.constant 0 : index
    %4 = vector.load %arg3[%c0_4, %c2, %c0_5] : memref<2x4x256xf32, #tpu.memory_space<vmem>>, vector<2x1x256xf32>
    %5 = vector.shape_cast %4 : vector<2x1x256xf32> to vector<2x256xf32>
    %c0_6 = arith.constant 0 : index
    %c3 = arith.constant 3 : index
    %c0_7 = arith.constant 0 : index
    %6 = vector.load %arg3[%c0_6, %c3, %c0_7] : memref<2x4x256xf32, #tpu.memory_space<vmem>>, vector<2x1x256xf32>
    %7 = vector.shape_cast %6 : vector<2x1x256xf32> to vector<2x256xf32>
    %8 = arith.addf %1, %3 : vector<2x256xf32>
    %9 = arith.addf %5, %7 : vector<2x256xf32>
    %10 = arith.addf %8, %9 : vector<2x256xf32>
    %11 = arith.maximumf %1, %3 : vector<2x256xf32>
    %12 = arith.maximumf %5, %7 : vector<2x256xf32>
    %13 = arith.maximumf %11, %12 : vector<2x256xf32>
    %cst = arith.constant 2.500000e-01 : f32
    %14 = vector.broadcast %cst : f32 to vector<2x256xf32>
    %15 = arith.mulf %10, %14 : vector<2x256xf32>
    %cst_8 = arith.constant 0.000000e+00 : f32
    %16 = vector.broadcast %cst_8 : f32 to vector<2x2x51xf32>
    %c0_9 = arith.constant 0 : index
    %c0_10 = arith.constant 0 : index
    %c0_11 = arith.constant 0 : index
    %17 = vector.load %arg5[%c0_9, %c0_10, %c0_11] : memref<2x2x358xf32, #tpu.memory_space<vmem>>, vector<2x2x51xf32>
    tpu.vector_store %arg5[%c0_9, %c0_10, %c0_11], %16 {strides = array<i32>} : memref<2x2x358xf32, #tpu.memory_space<vmem>>, vector<2x2x51xf32>,
    %c0_12 = arith.constant 0 : index
    %c0_13 = arith.constant 0 : index
    %c307 = arith.constant 307 : index
    %18 = vector.load %arg5[%c0_12, %c0_13, %c307] : memref<2x2x358xf32, #tpu.memory_space<vmem>>, vector<2x2x51xf32>
    tpu.vector_store %arg5[%c0_12, %c0_13, %c307], %16 {strides = array<i32>} : memref<2x2x358xf32, #tpu.memory_space<vmem>>, vector<2x2x51xf32>,
    %c0_14 = arith.constant 0 : index
    %c0_15 = arith.constant 0 : index
    %c51 = arith.constant 51 : index
    %19 = vector.load %arg5[%c0_14, %c0_15, %c51] : memref<2x2x358xf32, #tpu.memory_space<vmem>>, vector<1x2x256xf32>
    %20 = vector.shape_cast %19 : vector<1x2x256xf32> to vector<2x256xf32>
    %21 = vector.shape_cast %15 : vector<2x256xf32> to vector<1x2x256xf32>
    tpu.vector_store %arg5[%c0_14, %c0_15, %c51], %21 {strides = array<i32>} : memref<2x2x358xf32, #tpu.memory_space<vmem>>, vector<1x2x256xf32>,
    %c1_16 = arith.constant 1 : index
    %c0_17 = arith.constant 0 : index
    %c51_18 = arith.constant 51 : index
    %22 = vector.load %arg5[%c1_16, %c0_17, %c51_18] : memref<2x2x358xf32, #tpu.memory_space<vmem>>, vector<1x2x256xf32>
    %23 = vector.shape_cast %22 : vector<1x2x256xf32> to vector<2x256xf32>
    %24 = vector.shape_cast %13 : vector<2x256xf32> to vector<1x2x256xf32>
    tpu.vector_store %arg5[%c1_16, %c0_17, %c51_18], %24 {strides = array<i32>} : memref<2x2x358xf32, #tpu.memory_space<vmem>>, vector<1x2x256xf32>,
    %c0_19 = arith.constant 0 : index
    %25 = memref.load %arg1[%c0_19] : memref<98xf32, #tpu.memory_space<smem>>
    %c0_20 = arith.constant 0 : index
    %c0_21 = arith.constant 0 : index
    %c0_22 = arith.constant 0 : index
    %26 = vector.load %arg5[%c0_20, %c0_21, %c0_22] : memref<2x2x358xf32, #tpu.memory_space<vmem>>, vector<1x2x256xf32>
    %27 = vector.shape_cast %26 : vector<1x2x256xf32> to vector<2x256xf32>
    %28 = vector.broadcast %25 : f32 to vector<2x256xf32>
    %29 = arith.mulf %28, %27 : vector<2x256xf32>
    %c7 = arith.constant 7 : index
    %30 = memref.load %arg1[%c7] : memref<98xf32, #tpu.memory_space<smem>>
    %c0_23 = arith.constant 0 : index
    %c0_24 = arith.constant 0 : index
    %c16 = arith.constant 16 : index
    %31 = vector.load %arg5[%c0_23, %c0_24, %c16] : memref<2x2x358xf32, #tpu.memory_space<vmem>>, vector<1x2x256xf32>
    %32 = vector.shape_cast %31 : vector<1x2x256xf32> to vector<2x256xf32>
    %33 = vector.broadcast %30 : f32 to vector<2x256xf32>
    %34 = arith.mulf %33, %32 : vector<2x256xf32>
    %c14 = arith.constant 14 : index
    %35 = memref.load %arg1[%c14] : memref<98xf32, #tpu.memory_space<smem>>
    %c0_25 = arith.constant 0 : index
    %c0_26 = arith.constant 0 : index
    %c32 = arith.constant 32 : index
    %36 = vector.load %arg5[%c0_25, %c0_26, %c32] : memref<2x2x358xf32, #tpu.memory_space<vmem>>, vector<1x2x256xf32>
    %37 = vector.shape_cast %36 : vector<1x2x256xf32> to vector<2x256xf32>
    %38 = vector.broadcast %35 : f32 to vector<2x256xf32>
    %39 = arith.mulf %38, %37 : vector<2x256xf32>
    %40 = arith.addf %29, %39 : vector<2x256xf32>
    %c21 = arith.constant 21 : index
    %41 = memref.load %arg1[%c21] : memref<98xf32, #tpu.memory_space<smem>>
    %c0_27 = arith.constant 0 : index
    %c0_28 = arith.constant 0 : index
    %c48 = arith.constant 48 : index
    %42 = vector.load %arg5[%c0_27, %c0_28, %c48] : memref<2x2x358xf32, #tpu.memory_space<vmem>>, vector<1x2x256xf32>
    %43 = vector.shape_cast %42 : vector<1x2x256xf32> to vector<2x256xf32>
    %44 = vector.broadcast %41 : f32 to vector<2x256xf32>
    %45 = arith.mulf %44, %43 : vector<2x256xf32>
    %46 = arith.addf %34, %45 : vector<2x256xf32>
    %c28 = arith.constant 28 : index
    %47 = memref.load %arg1[%c28] : memref<98xf32, #tpu.memory_space<smem>>
    %c0_29 = arith.constant 0 : index
    %c0_30 = arith.constant 0 : index
    %c64 = arith.constant 64 : index
    %48 = vector.load %arg5[%c0_29, %c0_30, %c64] : memref<2x2x358xf32, #tpu.memory_space<vmem>>, vector<1x2x256xf32>
    %49 = vector.shape_cast %48 : vector<1x2x256xf32> to vector<2x256xf32>
    %50 = vector.broadcast %47 : f32 to vector<2x256xf32>
    %51 = arith.mulf %50, %49 : vector<2x256xf32>
    %52 = arith.addf %40, %51 : vector<2x256xf32>
    %c35 = arith.constant 35 : index
    %53 = memref.load %arg1[%c35] : memref<98xf32, #tpu.memory_space<smem>>
    %c0_31 = arith.constant 0 : index
    %c0_32 = arith.constant 0 : index
    %c80 = arith.constant 80 : index
    %54 = vector.load %arg5[%c0_31, %c0_32, %c80] : memref<2x2x358xf32, #tpu.memory_space<vmem>>, vector<1x2x256xf32>
    %55 = vector.shape_cast %54 : vector<1x2x256xf32> to vector<2x256xf32>
    %56 = vector.broadcast %53 : f32 to vector<2x256xf32>
    %57 = arith.mulf %56, %55 : vector<2x256xf32>
    %58 = arith.addf %46, %57 : vector<2x256xf32>
    %c42 = arith.constant 42 : index
    %59 = memref.load %arg1[%c42] : memref<98xf32, #tpu.memory_space<smem>>
    %c0_33 = arith.constant 0 : index
    %c0_34 = arith.constant 0 : index
    %c96 = arith.constant 96 : index
    %60 = vector.load %arg5[%c0_33, %c0_34, %c96] : memref<2x2x358xf32, #tpu.memory_space<vmem>>, vector<1x2x256xf32>
    %61 = vector.shape_cast %60 : vector<1x2x256xf32> to vector<2x256xf32>
    %62 = vector.broadcast %59 : f32 to vector<2x256xf32>
    %63 = arith.mulf %62, %61 : vector<2x256xf32>
    %64 = arith.addf %52, %63 : vector<2x256xf32>
    %c49 = arith.constant 49 : index
    %65 = memref.load %arg1[%c49] : memref<98xf32, #tpu.memory_space<smem>>
    %c1_35 = arith.constant 1 : index
    %c0_36 = arith.constant 0 : index
    %c0_37 = arith.constant 0 : index
    %66 = vector.load %arg5[%c1_35, %c0_36, %c0_37] : memref<2x2x358xf32, #tpu.memory_space<vmem>>, vector<1x2x256xf32>
    %67 = vector.shape_cast %66 : vector<1x2x256xf32> to vector<2x256xf32>
    %68 = vector.broadcast %65 : f32 to vector<2x256xf32>
    %69 = arith.mulf %68, %67 : vector<2x256xf32>
    %70 = arith.addf %64, %69 : vector<2x256xf32>
    %c56 = arith.constant 56 : index
    %71 = memref.load %arg1[%c56] : memref<98xf32, #tpu.memory_space<smem>>
    %c1_38 = arith.constant 1 : index
    %c0_39 = arith.constant 0 : index
    %c16_40 = arith.constant 16 : index
    %72 = vector.load %arg5[%c1_38, %c0_39, %c16_40] : memref<2x2x358xf32, #tpu.memory_space<vmem>>, vector<1x2x256xf32>
    %73 = vector.shape_cast %72 : vector<1x2x256xf32> to vector<2x256xf32>
    %74 = vector.broadcast %71 : f32 to vector<2x256xf32>
    %75 = arith.mulf %74, %73 : vector<2x256xf32>
    %76 = arith.addf %58, %75 : vector<2x256xf32>
    %c63 = arith.constant 63 : index
    %77 = memref.load %arg1[%c63] : memref<98xf32, #tpu.memory_space<smem>>
    %c1_41 = arith.constant 1 : index
    %c0_42 = arith.constant 0 : index
    %c32_43 = arith.constant 32 : index
    %78 = vector.load %arg5[%c1_41, %c0_42, %c32_43] : memref<2x2x358xf32, #tpu.memory_space<vmem>>, vector<1x2x256xf32>
    %79 = vector.shape_cast %78 : vector<1x2x256xf32> to vector<2x256xf32>
    %80 = vector.broadcast %77 : f32 to vector<2x256xf32>
    %81 = arith.mulf %80, %79 : vector<2x256xf32>
    %82 = arith.addf %70, %81 : vector<2x256xf32>
    %c70 = arith.constant 70 : index
    %83 = memref.load %arg1[%c70] : memref<98xf32, #tpu.memory_space<smem>>
    %c1_44 = arith.constant 1 : index
    %c0_45 = arith.constant 0 : index
    %c48_46 = arith.constant 48 : index
    %84 = vector.load %arg5[%c1_44, %c0_45, %c48_46] : memref<2x2x358xf32, #tpu.memory_space<vmem>>, vector<1x2x256xf32>
    %85 = vector.shape_cast %84 : vector<1x2x256xf32> to vector<2x256xf32>
    %86 = vector.broadcast %83 : f32 to vector<2x256xf32>
    %87 = arith.mulf %86, %85 : vector<2x256xf32>
    %88 = arith.addf %76, %87 : vector<2x256xf32>
    %c77 = arith.constant 77 : index
    %89 = memref.load %arg1[%c77] : memref<98xf32, #tpu.memory_space<smem>>
    %c1_47 = arith.constant 1 : index
    %c0_48 = arith.constant 0 : index
    %c64_49 = arith.constant 64 : index
    %90 = vector.load %arg5[%c1_47, %c0_48, %c64_49] : memref<2x2x358xf32, #tpu.memory_space<vmem>>, vector<1x2x256xf32>
    %91 = vector.shape_cast %90 : vector<1x2x256xf32> to vector<2x256xf32>
    %92 = vector.broadcast %89 : f32 to vector<2x256xf32>
    %93 = arith.mulf %92, %91 : vector<2x256xf32>
    %94 = arith.addf %82, %93 : vector<2x256xf32>
    %c84 = arith.constant 84 : index
    %95 = memref.load %arg1[%c84] : memref<98xf32, #tpu.memory_space<smem>>
    %c1_50 = arith.constant 1 : index
    %c0_51 = arith.constant 0 : index
    %c80_52 = arith.constant 80 : index
    %96 = vector.load %arg5[%c1_50, %c0_51, %c80_52] : memref<2x2x358xf32, #tpu.memory_space<vmem>>, vector<1x2x256xf32>
    %97 = vector.shape_cast %96 : vector<1x2x256xf32> to vector<2x256xf32>
    %98 = vector.broadcast %95 : f32 to vector<2x256xf32>
    %99 = arith.mulf %98, %97 : vector<2x256xf32>
    %100 = arith.addf %88, %99 : vector<2x256xf32>
    %c91 = arith.constant 91 : index
    %101 = memref.load %arg1[%c91] : memref<98xf32, #tpu.memory_space<smem>>
    %c1_53 = arith.constant 1 : index
    %c0_54 = arith.constant 0 : index
    %c96_55 = arith.constant 96 : index
    %102 = vector.load %arg5[%c1_53, %c0_54, %c96_55] : memref<2x2x358xf32, #tpu.memory_space<vmem>>, vector<1x2x256xf32>
    %103 = vector.shape_cast %102 : vector<1x2x256xf32> to vector<2x256xf32>
    %104 = vector.broadcast %101 : f32 to vector<2x256xf32>
    %105 = arith.mulf %104, %103 : vector<2x256xf32>
    %106 = arith.addf %94, %105 : vector<2x256xf32>
    %c0_56 = arith.constant 0 : index
    %c0_57 = arith.constant 0 : index
    %107 = vector.load %arg2[%c0_56, %c0_57] : memref<7x256xf32, #tpu.memory_space<vmem>>, vector<1x256xf32>
    %108 = arith.addf %106, %100 : vector<2x256xf32>
    %109 = vector.broadcast %107 : vector<1x256xf32> to vector<2x256xf32>
    %110 = arith.mulf %109, %108 : vector<2x256xf32>
    %c1_58 = arith.constant 1 : index
    %111 = memref.load %arg1[%c1_58] : memref<98xf32, #tpu.memory_space<smem>>
    %c0_59 = arith.constant 0 : index
    %c0_60 = arith.constant 0 : index
    %c1_61 = arith.constant 1 : index
    %112 = vector.load %arg5[%c0_59, %c0_60, %c1_61] : memref<2x2x358xf32, #tpu.memory_space<vmem>>, vector<1x2x256xf32>
    %113 = vector.shape_cast %112 : vector<1x2x256xf32> to vector<2x256xf32>
    %114 = vector.broadcast %111 : f32 to vector<2x256xf32>
    %115 = arith.mulf %114, %113 : vector<2x256xf32>
    %c8 = arith.constant 8 : index
    %116 = memref.load %arg1[%c8] : memref<98xf32, #tpu.memory_space<smem>>
    %c0_62 = arith.constant 0 : index
    %c0_63 = arith.constant 0 : index
    %c17 = arith.constant 17 : index
    %117 = vector.load %arg5[%c0_62, %c0_63, %c17] : memref<2x2x358xf32, #tpu.memory_space<vmem>>, vector<1x2x256xf32>
    %118 = vector.shape_cast %117 : vector<1x2x256xf32> to vector<2x256xf32>
    %119 = vector.broadcast %116 : f32 to vector<2x256xf32>
    %120 = arith.mulf %119, %118 : vector<2x256xf32>
    %c15 = arith.constant 15 : index
    %121 = memref.load %arg1[%c15] : memref<98xf32, #tpu.memory_space<smem>>
    %c0_64 = arith.constant 0 : index
    %c0_65 = arith.constant 0 : index
    %c33 = arith.constant 33 : index
    %122 = vector.load %arg5[%c0_64, %c0_65, %c33] : memref<2x2x358xf32, #tpu.memory_space<vmem>>, vector<1x2x256xf32>
    %123 = vector.shape_cast %122 : vector<1x2x256xf32> to vector<2x256xf32>
    %124 = vector.broadcast %121 : f32 to vector<2x256xf32>
    %125 = arith.mulf %124, %123 : vector<2x256xf32>
    %126 = arith.addf %115, %125 : vector<2x256xf32>
    %c22 = arith.constant 22 : index
    %127 = memref.load %arg1[%c22] : memref<98xf32, #tpu.memory_space<smem>>
    %c0_66 = arith.constant 0 : index
    %c0_67 = arith.constant 0 : index
    %c49_68 = arith.constant 49 : index
    %128 = vector.load %arg5[%c0_66, %c0_67, %c49_68] : memref<2x2x358xf32, #tpu.memory_space<vmem>>, vector<1x2x256xf32>
    %129 = vector.shape_cast %128 : vector<1x2x256xf32> to vector<2x256xf32>
    %130 = vector.broadcast %127 : f32 to vector<2x256xf32>
    %131 = arith.mulf %130, %129 : vector<2x256xf32>
    %132 = arith.addf %120, %131 : vector<2x256xf32>
    %c29 = arith.constant 29 : index
    %133 = memref.load %arg1[%c29] : memref<98xf32, #tpu.memory_space<smem>>
    %c0_69 = arith.constant 0 : index
    %c0_70 = arith.constant 0 : index
    %c65 = arith.constant 65 : index
    %134 = vector.load %arg5[%c0_69, %c0_70, %c65] : memref<2x2x358xf32, #tpu.memory_space<vmem>>, vector<1x2x256xf32>
    %135 = vector.shape_cast %134 : vector<1x2x256xf32> to vector<2x256xf32>
    %136 = vector.broadcast %133 : f32 to vector<2x256xf32>
    %137 = arith.mulf %136, %135 : vector<2x256xf32>
    %138 = arith.addf %126, %137 : vector<2x256xf32>
    %c36 = arith.constant 36 : index
    %139 = memref.load %arg1[%c36] : memref<98xf32, #tpu.memory_space<smem>>
    %c0_71 = arith.constant 0 : index
    %c0_72 = arith.constant 0 : index
    %c81 = arith.constant 81 : index
    %140 = vector.load %arg5[%c0_71, %c0_72, %c81] : memref<2x2x358xf32, #tpu.memory_space<vmem>>, vector<1x2x256xf32>
    %141 = vector.shape_cast %140 : vector<1x2x256xf32> to vector<2x256xf32>
    %142 = vector.broadcast %139 : f32 to vector<2x256xf32>
    %143 = arith.mulf %142, %141 : vector<2x256xf32>
    %144 = arith.addf %132, %143 : vector<2x256xf32>
    %c43 = arith.constant 43 : index
    %145 = memref.load %arg1[%c43] : memref<98xf32, #tpu.memory_space<smem>>
    %c0_73 = arith.constant 0 : index
    %c0_74 = arith.constant 0 : index
    %c97 = arith.constant 97 : index
    %146 = vector.load %arg5[%c0_73, %c0_74, %c97] : memref<2x2x358xf32, #tpu.memory_space<vmem>>, vector<1x2x256xf32>
    %147 = vector.shape_cast %146 : vector<1x2x256xf32> to vector<2x256xf32>
    %148 = vector.broadcast %145 : f32 to vector<2x256xf32>
    %149 = arith.mulf %148, %147 : vector<2x256xf32>
    %150 = arith.addf %138, %149 : vector<2x256xf32>
    %c50 = arith.constant 50 : index
    %151 = memref.load %arg1[%c50] : memref<98xf32, #tpu.memory_space<smem>>
    %c1_75 = arith.constant 1 : index
    %c0_76 = arith.constant 0 : index
    %c1_77 = arith.constant 1 : index
    %152 = vector.load %arg5[%c1_75, %c0_76, %c1_77] : memref<2x2x358xf32, #tpu.memory_space<vmem>>, vector<1x2x256xf32>
    %153 = vector.shape_cast %152 : vector<1x2x256xf32> to vector<2x256xf32>
    %154 = vector.broadcast %151 : f32 to vector<2x256xf32>
    %155 = arith.mulf %154, %153 : vector<2x256xf32>
    %156 = arith.addf %150, %155 : vector<2x256xf32>
    %c57 = arith.constant 57 : index
    %157 = memref.load %arg1[%c57] : memref<98xf32, #tpu.memory_space<smem>>
    %c1_78 = arith.constant 1 : index
    %c0_79 = arith.constant 0 : index
    %c17_80 = arith.constant 17 : index
    %158 = vector.load %arg5[%c1_78, %c0_79, %c17_80] : memref<2x2x358xf32, #tpu.memory_space<vmem>>, vector<1x2x256xf32>
    %159 = vector.shape_cast %158 : vector<1x2x256xf32> to vector<2x256xf32>
    %160 = vector.broadcast %157 : f32 to vector<2x256xf32>
    %161 = arith.mulf %160, %159 : vector<2x256xf32>
    %162 = arith.addf %144, %161 : vector<2x256xf32>
    %c64_81 = arith.constant 64 : index
    %163 = memref.load %arg1[%c64_81] : memref<98xf32, #tpu.memory_space<smem>>
    %c1_82 = arith.constant 1 : index
    %c0_83 = arith.constant 0 : index
    %c33_84 = arith.constant 33 : index
    %164 = vector.load %arg5[%c1_82, %c0_83, %c33_84] : memref<2x2x358xf32, #tpu.memory_space<vmem>>, vector<1x2x256xf32>
    %165 = vector.shape_cast %164 : vector<1x2x256xf32> to vector<2x256xf32>
    %166 = vector.broadcast %163 : f32 to vector<2x256xf32>
    %167 = arith.mulf %166, %165 : vector<2x256xf32>
    %168 = arith.addf %156, %167 : vector<2x256xf32>
    %c71 = arith.constant 71 : index
    %169 = memref.load %arg1[%c71] : memref<98xf32, #tpu.memory_space<smem>>
    %c1_85 = arith.constant 1 : index
    %c0_86 = arith.constant 0 : index
    %c49_87 = arith.constant 49 : index
    %170 = vector.load %arg5[%c1_85, %c0_86, %c49_87] : memref<2x2x358xf32, #tpu.memory_space<vmem>>, vector<1x2x256xf32>
    %171 = vector.shape_cast %170 : vector<1x2x256xf32> to vector<2x256xf32>
    %172 = vector.broadcast %169 : f32 to vector<2x256xf32>
    %173 = arith.mulf %172, %171 : vector<2x256xf32>
    %174 = arith.addf %162, %173 : vector<2x256xf32>
    %c78 = arith.constant 78 : index
    %175 = memref.load %arg1[%c78] : memref<98xf32, #tpu.memory_space<smem>>
    %c1_88 = arith.constant 1 : index
    %c0_89 = arith.constant 0 : index
    %c65_90 = arith.constant 65 : index
    %176 = vector.load %arg5[%c1_88, %c0_89, %c65_90] : memref<2x2x358xf32, #tpu.memory_space<vmem>>, vector<1x2x256xf32>
    %177 = vector.shape_cast %176 : vector<1x2x256xf32> to vector<2x256xf32>
    %178 = vector.broadcast %175 : f32 to vector<2x256xf32>
    %179 = arith.mulf %178, %177 : vector<2x256xf32>
    %180 = arith.addf %168, %179 : vector<2x256xf32>
    %c85 = arith.constant 85 : index
    %181 = memref.load %arg1[%c85] : memref<98xf32, #tpu.memory_space<smem>>
    %c1_91 = arith.constant 1 : index
    %c0_92 = arith.constant 0 : index
    %c81_93 = arith.constant 81 : index
    %182 = vector.load %arg5[%c1_91, %c0_92, %c81_93] : memref<2x2x358xf32, #tpu.memory_space<vmem>>, vector<1x2x256xf32>
    %183 = vector.shape_cast %182 : vector<1x2x256xf32> to vector<2x256xf32>
    %184 = vector.broadcast %181 : f32 to vector<2x256xf32>
    %185 = arith.mulf %184, %183 : vector<2x256xf32>
    %186 = arith.addf %174, %185 : vector<2x256xf32>
    %c92 = arith.constant 92 : index
    %187 = memref.load %arg1[%c92] : memref<98xf32, #tpu.memory_space<smem>>
    %c1_94 = arith.constant 1 : index
    %c0_95 = arith.constant 0 : index
    %c97_96 = arith.constant 97 : index
    %188 = vector.load %arg5[%c1_94, %c0_95, %c97_96] : memref<2x2x358xf32, #tpu.memory_space<vmem>>, vector<1x2x256xf32>
    %189 = vector.shape_cast %188 : vector<1x2x256xf32> to vector<2x256xf32>
    %190 = vector.broadcast %187 : f32 to vector<2x256xf32>
    %191 = arith.mulf %190, %189 : vector<2x256xf32>
    %192 = arith.addf %180, %191 : vector<2x256xf32>
    %c1_97 = arith.constant 1 : index
    %c0_98 = arith.constant 0 : index
    %193 = vector.load %arg2[%c1_97, %c0_98] : memref<7x256xf32, #tpu.memory_space<vmem>>, vector<1x256xf32>
    %194 = arith.addf %192, %186 : vector<2x256xf32>
    %195 = vector.broadcast %193 : vector<1x256xf32> to vector<2x256xf32>
    %196 = arith.mulf %195, %194 : vector<2x256xf32>
    %c2_99 = arith.constant 2 : index
    %197 = memref.load %arg1[%c2_99] : memref<98xf32, #tpu.memory_space<smem>>
    %c0_100 = arith.constant 0 : index
    %c0_101 = arith.constant 0 : index
    %c2_102 = arith.constant 2 : index
    %198 = vector.load %arg5[%c0_100, %c0_101, %c2_102] : memref<2x2x358xf32, #tpu.memory_space<vmem>>, vector<1x2x256xf32>
    %199 = vector.shape_cast %198 : vector<1x2x256xf32> to vector<2x256xf32>
    %200 = vector.broadcast %197 : f32 to vector<2x256xf32>
    %201 = arith.mulf %200, %199 : vector<2x256xf32>
    %c9 = arith.constant 9 : index
    %202 = memref.load %arg1[%c9] : memref<98xf32, #tpu.memory_space<smem>>
    %c0_103 = arith.constant 0 : index
    %c0_104 = arith.constant 0 : index
    %c18 = arith.constant 18 : index
    %203 = vector.load %arg5[%c0_103, %c0_104, %c18] : memref<2x2x358xf32, #tpu.memory_space<vmem>>, vector<1x2x256xf32>
    %204 = vector.shape_cast %203 : vector<1x2x256xf32> to vector<2x256xf32>
    %205 = vector.broadcast %202 : f32 to vector<2x256xf32>
    %206 = arith.mulf %205, %204 : vector<2x256xf32>
    %c16_105 = arith.constant 16 : index
    %207 = memref.load %arg1[%c16_105] : memref<98xf32, #tpu.memory_space<smem>>
    %c0_106 = arith.constant 0 : index
    %c0_107 = arith.constant 0 : index
    %c34 = arith.constant 34 : index
    %208 = vector.load %arg5[%c0_106, %c0_107, %c34] : memref<2x2x358xf32, #tpu.memory_space<vmem>>, vector<1x2x256xf32>
    %209 = vector.shape_cast %208 : vector<1x2x256xf32> to vector<2x256xf32>
    %210 = vector.broadcast %207 : f32 to vector<2x256xf32>
    %211 = arith.mulf %210, %209 : vector<2x256xf32>
    %212 = arith.addf %201, %211 : vector<2x256xf32>
    %c23 = arith.constant 23 : index
    %213 = memref.load %arg1[%c23] : memref<98xf32, #tpu.memory_space<smem>>
    %c0_108 = arith.constant 0 : index
    %c0_109 = arith.constant 0 : index
    %c50_110 = arith.constant 50 : index
    %214 = vector.load %arg5[%c0_108, %c0_109, %c50_110] : memref<2x2x358xf32, #tpu.memory_space<vmem>>, vector<1x2x256xf32>
    %215 = vector.shape_cast %214 : vector<1x2x256xf32> to vector<2x256xf32>
    %216 = vector.broadcast %213 : f32 to vector<2x256xf32>
    %217 = arith.mulf %216, %215 : vector<2x256xf32>
    %218 = arith.addf %206, %217 : vector<2x256xf32>
    %c30 = arith.constant 30 : index
    %219 = memref.load %arg1[%c30] : memref<98xf32, #tpu.memory_space<smem>>
    %c0_111 = arith.constant 0 : index
    %c0_112 = arith.constant 0 : index
    %c66 = arith.constant 66 : index
    %220 = vector.load %arg5[%c0_111, %c0_112, %c66] : memref<2x2x358xf32, #tpu.memory_space<vmem>>, vector<1x2x256xf32>
    %221 = vector.shape_cast %220 : vector<1x2x256xf32> to vector<2x256xf32>
    %222 = vector.broadcast %219 : f32 to vector<2x256xf32>
    %223 = arith.mulf %222, %221 : vector<2x256xf32>
    %224 = arith.addf %212, %223 : vector<2x256xf32>
    %c37 = arith.constant 37 : index
    %225 = memref.load %arg1[%c37] : memref<98xf32, #tpu.memory_space<smem>>
    %c0_113 = arith.constant 0 : index
    %c0_114 = arith.constant 0 : index
    %c82 = arith.constant 82 : index
    %226 = vector.load %arg5[%c0_113, %c0_114, %c82] : memref<2x2x358xf32, #tpu.memory_space<vmem>>, vector<1x2x256xf32>
    %227 = vector.shape_cast %226 : vector<1x2x256xf32> to vector<2x256xf32>
    %228 = vector.broadcast %225 : f32 to vector<2x256xf32>
    %229 = arith.mulf %228, %227 : vector<2x256xf32>
    %230 = arith.addf %218, %229 : vector<2x256xf32>
    %c44 = arith.constant 44 : index
    %231 = memref.load %arg1[%c44] : memref<98xf32, #tpu.memory_space<smem>>
    %c0_115 = arith.constant 0 : index
    %c0_116 = arith.constant 0 : index
    %c98 = arith.constant 98 : index
    %232 = vector.load %arg5[%c0_115, %c0_116, %c98] : memref<2x2x358xf32, #tpu.memory_space<vmem>>, vector<1x2x256xf32>
    %233 = vector.shape_cast %232 : vector<1x2x256xf32> to vector<2x256xf32>
    %234 = vector.broadcast %231 : f32 to vector<2x256xf32>
    %235 = arith.mulf %234, %233 : vector<2x256xf32>
    %236 = arith.addf %224, %235 : vector<2x256xf32>
    %c51_117 = arith.constant 51 : index
    %237 = memref.load %arg1[%c51_117] : memref<98xf32, #tpu.memory_space<smem>>
    %c1_118 = arith.constant 1 : index
    %c0_119 = arith.constant 0 : index
    %c2_120 = arith.constant 2 : index
    %238 = vector.load %arg5[%c1_118, %c0_119, %c2_120] : memref<2x2x358xf32, #tpu.memory_space<vmem>>, vector<1x2x256xf32>
    %239 = vector.shape_cast %238 : vector<1x2x256xf32> to vector<2x256xf32>
    %240 = vector.broadcast %237 : f32 to vector<2x256xf32>
    %241 = arith.mulf %240, %239 : vector<2x256xf32>
    %242 = arith.addf %236, %241 : vector<2x256xf32>
    %c58 = arith.constant 58 : index
    %243 = memref.load %arg1[%c58] : memref<98xf32, #tpu.memory_space<smem>>
    %c1_121 = arith.constant 1 : index
    %c0_122 = arith.constant 0 : index
    %c18_123 = arith.constant 18 : index
    %244 = vector.load %arg5[%c1_121, %c0_122, %c18_123] : memref<2x2x358xf32, #tpu.memory_space<vmem>>, vector<1x2x256xf32>
    %245 = vector.shape_cast %244 : vector<1x2x256xf32> to vector<2x256xf32>
    %246 = vector.broadcast %243 : f32 to vector<2x256xf32>
    %247 = arith.mulf %246, %245 : vector<2x256xf32>
    %248 = arith.addf %230, %247 : vector<2x256xf32>
    %c65_124 = arith.constant 65 : index
    %249 = memref.load %arg1[%c65_124] : memref<98xf32, #tpu.memory_space<smem>>
    %c1_125 = arith.constant 1 : index
    %c0_126 = arith.constant 0 : index
    %c34_127 = arith.constant 34 : index
    %250 = vector.load %arg5[%c1_125, %c0_126, %c34_127] : memref<2x2x358xf32, #tpu.memory_space<vmem>>, vector<1x2x256xf32>
    %251 = vector.shape_cast %250 : vector<1x2x256xf32> to vector<2x256xf32>
    %252 = vector.broadcast %249 : f32 to vector<2x256xf32>
    %253 = arith.mulf %252, %251 : vector<2x256xf32>
    %254 = arith.addf %242, %253 : vector<2x256xf32>
    %c72 = arith.constant 72 : index
    %255 = memref.load %arg1[%c72] : memref<98xf32, #tpu.memory_space<smem>>
    %c1_128 = arith.constant 1 : index
    %c0_129 = arith.constant 0 : index
    %c50_130 = arith.constant 50 : index
    %256 = vector.load %arg5[%c1_128, %c0_129, %c50_130] : memref<2x2x358xf32, #tpu.memory_space<vmem>>, vector<1x2x256xf32>
    %257 = vector.shape_cast %256 : vector<1x2x256xf32> to vector<2x256xf32>
    %258 = vector.broadcast %255 : f32 to vector<2x256xf32>
    %259 = arith.mulf %258, %257 : vector<2x256xf32>
    %260 = arith.addf %248, %259 : vector<2x256xf32>
    %c79 = arith.constant 79 : index
    %261 = memref.load %arg1[%c79] : memref<98xf32, #tpu.memory_space<smem>>
    %c1_131 = arith.constant 1 : index
    %c0_132 = arith.constant 0 : index
    %c66_133 = arith.constant 66 : index
    %262 = vector.load %arg5[%c1_131, %c0_132, %c66_133] : memref<2x2x358xf32, #tpu.memory_space<vmem>>, vector<1x2x256xf32>
    %263 = vector.shape_cast %262 : vector<1x2x256xf32> to vector<2x256xf32>
    %264 = vector.broadcast %261 : f32 to vector<2x256xf32>
    %265 = arith.mulf %264, %263 : vector<2x256xf32>
    %266 = arith.addf %254, %265 : vector<2x256xf32>
    %c86 = arith.constant 86 : index
    %267 = memref.load %arg1[%c86] : memref<98xf32, #tpu.memory_space<smem>>
    %c1_134 = arith.constant 1 : index
    %c0_135 = arith.constant 0 : index
    %c82_136 = arith.constant 82 : index
    %268 = vector.load %arg5[%c1_134, %c0_135, %c82_136] : memref<2x2x358xf32, #tpu.memory_space<vmem>>, vector<1x2x256xf32>
    %269 = vector.shape_cast %268 : vector<1x2x256xf32> to vector<2x256xf32>
    %270 = vector.broadcast %267 : f32 to vector<2x256xf32>
    %271 = arith.mulf %270, %269 : vector<2x256xf32>
    %272 = arith.addf %260, %271 : vector<2x256xf32>
    %c93 = arith.constant 93 : index
    %273 = memref.load %arg1[%c93] : memref<98xf32, #tpu.memory_space<smem>>
    %c1_137 = arith.constant 1 : index
    %c0_138 = arith.constant 0 : index
    %c98_139 = arith.constant 98 : index
    %274 = vector.load %arg5[%c1_137, %c0_138, %c98_139] : memref<2x2x358xf32, #tpu.memory_space<vmem>>, vector<1x2x256xf32>
    %275 = vector.shape_cast %274 : vector<1x2x256xf32> to vector<2x256xf32>
    %276 = vector.broadcast %273 : f32 to vector<2x256xf32>
    %277 = arith.mulf %276, %275 : vector<2x256xf32>
    %278 = arith.addf %266, %277 : vector<2x256xf32>
    %c2_140 = arith.constant 2 : index
    %c0_141 = arith.constant 0 : index
    %279 = vector.load %arg2[%c2_140, %c0_141] : memref<7x256xf32, #tpu.memory_space<vmem>>, vector<1x256xf32>
    %280 = arith.addf %278, %272 : vector<2x256xf32>
    %281 = vector.broadcast %279 : vector<1x256xf32> to vector<2x256xf32>
    %282 = arith.mulf %281, %280 : vector<2x256xf32>
    %c3_142 = arith.constant 3 : index
    %283 = memref.load %arg1[%c3_142] : memref<98xf32, #tpu.memory_space<smem>>
    %c0_143 = arith.constant 0 : index
    %c0_144 = arith.constant 0 : index
    %c3_145 = arith.constant 3 : index
    %284 = vector.load %arg5[%c0_143, %c0_144, %c3_145] : memref<2x2x358xf32, #tpu.memory_space<vmem>>, vector<1x2x256xf32>
    %285 = vector.shape_cast %284 : vector<1x2x256xf32> to vector<2x256xf32>
    %286 = vector.broadcast %283 : f32 to vector<2x256xf32>
    %287 = arith.mulf %286, %285 : vector<2x256xf32>
    %c10 = arith.constant 10 : index
    %288 = memref.load %arg1[%c10] : memref<98xf32, #tpu.memory_space<smem>>
    %c0_146 = arith.constant 0 : index
    %c0_147 = arith.constant 0 : index
    %c19 = arith.constant 19 : index
    %289 = vector.load %arg5[%c0_146, %c0_147, %c19] : memref<2x2x358xf32, #tpu.memory_space<vmem>>, vector<1x2x256xf32>
    %290 = vector.shape_cast %289 : vector<1x2x256xf32> to vector<2x256xf32>
    %291 = vector.broadcast %288 : f32 to vector<2x256xf32>
    %292 = arith.mulf %291, %290 : vector<2x256xf32>
    %c17_148 = arith.constant 17 : index
    %293 = memref.load %arg1[%c17_148] : memref<98xf32, #tpu.memory_space<smem>>
    %c0_149 = arith.constant 0 : index
    %c0_150 = arith.constant 0 : index
    %c35_151 = arith.constant 35 : index
    %294 = vector.load %arg5[%c0_149, %c0_150, %c35_151] : memref<2x2x358xf32, #tpu.memory_space<vmem>>, vector<1x2x256xf32>
    %295 = vector.shape_cast %294 : vector<1x2x256xf32> to vector<2x256xf32>
    %296 = vector.broadcast %293 : f32 to vector<2x256xf32>
    %297 = arith.mulf %296, %295 : vector<2x256xf32>
    %298 = arith.addf %287, %297 : vector<2x256xf32>
    %c24 = arith.constant 24 : index
    %299 = memref.load %arg1[%c24] : memref<98xf32, #tpu.memory_space<smem>>
    %c0_152 = arith.constant 0 : index
    %c0_153 = arith.constant 0 : index
    %c51_154 = arith.constant 51 : index
    %300 = vector.load %arg5[%c0_152, %c0_153, %c51_154] : memref<2x2x358xf32, #tpu.memory_space<vmem>>, vector<1x2x256xf32>
    %301 = vector.shape_cast %300 : vector<1x2x256xf32> to vector<2x256xf32>
    %302 = vector.broadcast %299 : f32 to vector<2x256xf32>
    %303 = arith.mulf %302, %301 : vector<2x256xf32>
    %304 = arith.addf %292, %303 : vector<2x256xf32>
    %c31 = arith.constant 31 : index
    %305 = memref.load %arg1[%c31] : memref<98xf32, #tpu.memory_space<smem>>
    %c0_155 = arith.constant 0 : index
    %c0_156 = arith.constant 0 : index
    %c67 = arith.constant 67 : index
    %306 = vector.load %arg5[%c0_155, %c0_156, %c67] : memref<2x2x358xf32, #tpu.memory_space<vmem>>, vector<1x2x256xf32>
    %307 = vector.shape_cast %306 : vector<1x2x256xf32> to vector<2x256xf32>
    %308 = vector.broadcast %305 : f32 to vector<2x256xf32>
    %309 = arith.mulf %308, %307 : vector<2x256xf32>
    %310 = arith.addf %298, %309 : vector<2x256xf32>
    %c38 = arith.constant 38 : index
    %311 = memref.load %arg1[%c38] : memref<98xf32, #tpu.memory_space<smem>>
    %c0_157 = arith.constant 0 : index
    %c0_158 = arith.constant 0 : index
    %c83 = arith.constant 83 : index
    %312 = vector.load %arg5[%c0_157, %c0_158, %c83] : memref<2x2x358xf32, #tpu.memory_space<vmem>>, vector<1x2x256xf32>
    %313 = vector.shape_cast %312 : vector<1x2x256xf32> to vector<2x256xf32>
    %314 = vector.broadcast %311 : f32 to vector<2x256xf32>
    %315 = arith.mulf %314, %313 : vector<2x256xf32>
    %316 = arith.addf %304, %315 : vector<2x256xf32>
    %c45 = arith.constant 45 : index
    %317 = memref.load %arg1[%c45] : memref<98xf32, #tpu.memory_space<smem>>
    %c0_159 = arith.constant 0 : index
    %c0_160 = arith.constant 0 : index
    %c99 = arith.constant 99 : index
    %318 = vector.load %arg5[%c0_159, %c0_160, %c99] : memref<2x2x358xf32, #tpu.memory_space<vmem>>, vector<1x2x256xf32>
    %319 = vector.shape_cast %318 : vector<1x2x256xf32> to vector<2x256xf32>
    %320 = vector.broadcast %317 : f32 to vector<2x256xf32>
    %321 = arith.mulf %320, %319 : vector<2x256xf32>
    %322 = arith.addf %310, %321 : vector<2x256xf32>
    %c52 = arith.constant 52 : index
    %323 = memref.load %arg1[%c52] : memref<98xf32, #tpu.memory_space<smem>>
    %c1_161 = arith.constant 1 : index
    %c0_162 = arith.constant 0 : index
    %c3_163 = arith.constant 3 : index
    %324 = vector.load %arg5[%c1_161, %c0_162, %c3_163] : memref<2x2x358xf32, #tpu.memory_space<vmem>>, vector<1x2x256xf32>
    %325 = vector.shape_cast %324 : vector<1x2x256xf32> to vector<2x256xf32>
    %326 = vector.broadcast %323 : f32 to vector<2x256xf32>
    %327 = arith.mulf %326, %325 : vector<2x256xf32>
    %328 = arith.addf %322, %327 : vector<2x256xf32>
    %c59 = arith.constant 59 : index
    %329 = memref.load %arg1[%c59] : memref<98xf32, #tpu.memory_space<smem>>
    %c1_164 = arith.constant 1 : index
    %c0_165 = arith.constant 0 : index
    %c19_166 = arith.constant 19 : index
    %330 = vector.load %arg5[%c1_164, %c0_165, %c19_166] : memref<2x2x358xf32, #tpu.memory_space<vmem>>, vector<1x2x256xf32>
    %331 = vector.shape_cast %330 : vector<1x2x256xf32> to vector<2x256xf32>
    %332 = vector.broadcast %329 : f32 to vector<2x256xf32>
    %333 = arith.mulf %332, %331 : vector<2x256xf32>
    %334 = arith.addf %316, %333 : vector<2x256xf32>
    %c66_167 = arith.constant 66 : index
    %335 = memref.load %arg1[%c66_167] : memref<98xf32, #tpu.memory_space<smem>>
    %c1_168 = arith.constant 1 : index
    %c0_169 = arith.constant 0 : index
    %c35_170 = arith.constant 35 : index
    %336 = vector.load %arg5[%c1_168, %c0_169, %c35_170] : memref<2x2x358xf32, #tpu.memory_space<vmem>>, vector<1x2x256xf32>
    %337 = vector.shape_cast %336 : vector<1x2x256xf32> to vector<2x256xf32>
    %338 = vector.broadcast %335 : f32 to vector<2x256xf32>
    %339 = arith.mulf %338, %337 : vector<2x256xf32>
    %340 = arith.addf %328, %339 : vector<2x256xf32>
    %c73 = arith.constant 73 : index
    %341 = memref.load %arg1[%c73] : memref<98xf32, #tpu.memory_space<smem>>
    %c1_171 = arith.constant 1 : index
    %c0_172 = arith.constant 0 : index
    %c51_173 = arith.constant 51 : index
    %342 = vector.load %arg5[%c1_171, %c0_172, %c51_173] : memref<2x2x358xf32, #tpu.memory_space<vmem>>, vector<1x2x256xf32>
    %343 = vector.shape_cast %342 : vector<1x2x256xf32> to vector<2x256xf32>
    %344 = vector.broadcast %341 : f32 to vector<2x256xf32>
    %345 = arith.mulf %344, %343 : vector<2x256xf32>
    %346 = arith.addf %334, %345 : vector<2x256xf32>
    %c80_174 = arith.constant 80 : index
    %347 = memref.load %arg1[%c80_174] : memref<98xf32, #tpu.memory_space<smem>>
    %c1_175 = arith.constant 1 : index
    %c0_176 = arith.constant 0 : index
    %c67_177 = arith.constant 67 : index
    %348 = vector.load %arg5[%c1_175, %c0_176, %c67_177] : memref<2x2x358xf32, #tpu.memory_space<vmem>>, vector<1x2x256xf32>
    %349 = vector.shape_cast %348 : vector<1x2x256xf32> to vector<2x256xf32>
    %350 = vector.broadcast %347 : f32 to vector<2x256xf32>
    %351 = arith.mulf %350, %349 : vector<2x256xf32>
    %352 = arith.addf %340, %351 : vector<2x256xf32>
    %c87 = arith.constant 87 : index
    %353 = memref.load %arg1[%c87] : memref<98xf32, #tpu.memory_space<smem>>
    %c1_178 = arith.constant 1 : index
    %c0_179 = arith.constant 0 : index
    %c83_180 = arith.constant 83 : index
    %354 = vector.load %arg5[%c1_178, %c0_179, %c83_180] : memref<2x2x358xf32, #tpu.memory_space<vmem>>, vector<1x2x256xf32>
    %355 = vector.shape_cast %354 : vector<1x2x256xf32> to vector<2x256xf32>
    %356 = vector.broadcast %353 : f32 to vector<2x256xf32>
    %357 = arith.mulf %356, %355 : vector<2x256xf32>
    %358 = arith.addf %346, %357 : vector<2x256xf32>
    %c94 = arith.constant 94 : index
    %359 = memref.load %arg1[%c94] : memref<98xf32, #tpu.memory_space<smem>>
    %c1_181 = arith.constant 1 : index
    %c0_182 = arith.constant 0 : index
    %c99_183 = arith.constant 99 : index
    %360 = vector.load %arg5[%c1_181, %c0_182, %c99_183] : memref<2x2x358xf32, #tpu.memory_space<vmem>>, vector<1x2x256xf32>
    %361 = vector.shape_cast %360 : vector<1x2x256xf32> to vector<2x256xf32>
    %362 = vector.broadcast %359 : f32 to vector<2x256xf32>
    %363 = arith.mulf %362, %361 : vector<2x256xf32>
    %364 = arith.addf %352, %363 : vector<2x256xf32>
    %c3_184 = arith.constant 3 : index
    %c0_185 = arith.constant 0 : index
    %365 = vector.load %arg2[%c3_184, %c0_185] : memref<7x256xf32, #tpu.memory_space<vmem>>, vector<1x256xf32>
    %366 = arith.addf %364, %358 : vector<2x256xf32>
    %367 = vector.broadcast %365 : vector<1x256xf32> to vector<2x256xf32>
    %368 = arith.mulf %367, %366 : vector<2x256xf32>
    %c4 = arith.constant 4 : index
    %369 = memref.load %arg1[%c4] : memref<98xf32, #tpu.memory_space<smem>>
    %c0_186 = arith.constant 0 : index
    %c0_187 = arith.constant 0 : index
    %c4_188 = arith.constant 4 : index
    %370 = vector.load %arg5[%c0_186, %c0_187, %c4_188] : memref<2x2x358xf32, #tpu.memory_space<vmem>>, vector<1x2x256xf32>
    %371 = vector.shape_cast %370 : vector<1x2x256xf32> to vector<2x256xf32>
    %372 = vector.broadcast %369 : f32 to vector<2x256xf32>
    %373 = arith.mulf %372, %371 : vector<2x256xf32>
    %c11 = arith.constant 11 : index
    %374 = memref.load %arg1[%c11] : memref<98xf32, #tpu.memory_space<smem>>
    %c0_189 = arith.constant 0 : index
    %c0_190 = arith.constant 0 : index
    %c20 = arith.constant 20 : index
    %375 = vector.load %arg5[%c0_189, %c0_190, %c20] : memref<2x2x358xf32, #tpu.memory_space<vmem>>, vector<1x2x256xf32>
    %376 = vector.shape_cast %375 : vector<1x2x256xf32> to vector<2x256xf32>
    %377 = vector.broadcast %374 : f32 to vector<2x256xf32>
    %378 = arith.mulf %377, %376 : vector<2x256xf32>
    %c18_191 = arith.constant 18 : index
    %379 = memref.load %arg1[%c18_191] : memref<98xf32, #tpu.memory_space<smem>>
    %c0_192 = arith.constant 0 : index
    %c0_193 = arith.constant 0 : index
    %c36_194 = arith.constant 36 : index
    %380 = vector.load %arg5[%c0_192, %c0_193, %c36_194] : memref<2x2x358xf32, #tpu.memory_space<vmem>>, vector<1x2x256xf32>
    %381 = vector.shape_cast %380 : vector<1x2x256xf32> to vector<2x256xf32>
    %382 = vector.broadcast %379 : f32 to vector<2x256xf32>
    %383 = arith.mulf %382, %381 : vector<2x256xf32>
    %384 = arith.addf %373, %383 : vector<2x256xf32>
    %c25 = arith.constant 25 : index
    %385 = memref.load %arg1[%c25] : memref<98xf32, #tpu.memory_space<smem>>
    %c0_195 = arith.constant 0 : index
    %c0_196 = arith.constant 0 : index
    %c52_197 = arith.constant 52 : index
    %386 = vector.load %arg5[%c0_195, %c0_196, %c52_197] : memref<2x2x358xf32, #tpu.memory_space<vmem>>, vector<1x2x256xf32>
    %387 = vector.shape_cast %386 : vector<1x2x256xf32> to vector<2x256xf32>
    %388 = vector.broadcast %385 : f32 to vector<2x256xf32>
    %389 = arith.mulf %388, %387 : vector<2x256xf32>
    %390 = arith.addf %378, %389 : vector<2x256xf32>
    %c32_198 = arith.constant 32 : index
    %391 = memref.load %arg1[%c32_198] : memref<98xf32, #tpu.memory_space<smem>>
    %c0_199 = arith.constant 0 : index
    %c0_200 = arith.constant 0 : index
    %c68 = arith.constant 68 : index
    %392 = vector.load %arg5[%c0_199, %c0_200, %c68] : memref<2x2x358xf32, #tpu.memory_space<vmem>>, vector<1x2x256xf32>
    %393 = vector.shape_cast %392 : vector<1x2x256xf32> to vector<2x256xf32>
    %394 = vector.broadcast %391 : f32 to vector<2x256xf32>
    %395 = arith.mulf %394, %393 : vector<2x256xf32>
    %396 = arith.addf %384, %395 : vector<2x256xf32>
    %c39 = arith.constant 39 : index
    %397 = memref.load %arg1[%c39] : memref<98xf32, #tpu.memory_space<smem>>
    %c0_201 = arith.constant 0 : index
    %c0_202 = arith.constant 0 : index
    %c84_203 = arith.constant 84 : index
    %398 = vector.load %arg5[%c0_201, %c0_202, %c84_203] : memref<2x2x358xf32, #tpu.memory_space<vmem>>, vector<1x2x256xf32>
    %399 = vector.shape_cast %398 : vector<1x2x256xf32> to vector<2x256xf32>
    %400 = vector.broadcast %397 : f32 to vector<2x256xf32>
    %401 = arith.mulf %400, %399 : vector<2x256xf32>
    %402 = arith.addf %390, %401 : vector<2x256xf32>
    %c46 = arith.constant 46 : index
    %403 = memref.load %arg1[%c46] : memref<98xf32, #tpu.memory_space<smem>>
    %c0_204 = arith.constant 0 : index
    %c0_205 = arith.constant 0 : index
    %c100 = arith.constant 100 : index
    %404 = vector.load %arg5[%c0_204, %c0_205, %c100] : memref<2x2x358xf32, #tpu.memory_space<vmem>>, vector<1x2x256xf32>
    %405 = vector.shape_cast %404 : vector<1x2x256xf32> to vector<2x256xf32>
    %406 = vector.broadcast %403 : f32 to vector<2x256xf32>
    %407 = arith.mulf %406, %405 : vector<2x256xf32>
    %408 = arith.addf %396, %407 : vector<2x256xf32>
    %c53 = arith.constant 53 : index
    %409 = memref.load %arg1[%c53] : memref<98xf32, #tpu.memory_space<smem>>
    %c1_206 = arith.constant 1 : index
    %c0_207 = arith.constant 0 : index
    %c4_208 = arith.constant 4 : index
    %410 = vector.load %arg5[%c1_206, %c0_207, %c4_208] : memref<2x2x358xf32, #tpu.memory_space<vmem>>, vector<1x2x256xf32>
    %411 = vector.shape_cast %410 : vector<1x2x256xf32> to vector<2x256xf32>
    %412 = vector.broadcast %409 : f32 to vector<2x256xf32>
    %413 = arith.mulf %412, %411 : vector<2x256xf32>
    %414 = arith.addf %408, %413 : vector<2x256xf32>
    %c60 = arith.constant 60 : index
    %415 = memref.load %arg1[%c60] : memref<98xf32, #tpu.memory_space<smem>>
    %c1_209 = arith.constant 1 : index
    %c0_210 = arith.constant 0 : index
    %c20_211 = arith.constant 20 : index
    %416 = vector.load %arg5[%c1_209, %c0_210, %c20_211] : memref<2x2x358xf32, #tpu.memory_space<vmem>>, vector<1x2x256xf32>
    %417 = vector.shape_cast %416 : vector<1x2x256xf32> to vector<2x256xf32>
    %418 = vector.broadcast %415 : f32 to vector<2x256xf32>
    %419 = arith.mulf %418, %417 : vector<2x256xf32>
    %420 = arith.addf %402, %419 : vector<2x256xf32>
    %c67_212 = arith.constant 67 : index
    %421 = memref.load %arg1[%c67_212] : memref<98xf32, #tpu.memory_space<smem>>
    %c1_213 = arith.constant 1 : index
    %c0_214 = arith.constant 0 : index
    %c36_215 = arith.constant 36 : index
    %422 = vector.load %arg5[%c1_213, %c0_214, %c36_215] : memref<2x2x358xf32, #tpu.memory_space<vmem>>, vector<1x2x256xf32>
    %423 = vector.shape_cast %422 : vector<1x2x256xf32> to vector<2x256xf32>
    %424 = vector.broadcast %421 : f32 to vector<2x256xf32>
    %425 = arith.mulf %424, %423 : vector<2x256xf32>
    %426 = arith.addf %414, %425 : vector<2x256xf32>
    %c74 = arith.constant 74 : index
    %427 = memref.load %arg1[%c74] : memref<98xf32, #tpu.memory_space<smem>>
    %c1_216 = arith.constant 1 : index
    %c0_217 = arith.constant 0 : index
    %c52_218 = arith.constant 52 : index
    %428 = vector.load %arg5[%c1_216, %c0_217, %c52_218] : memref<2x2x358xf32, #tpu.memory_space<vmem>>, vector<1x2x256xf32>
    %429 = vector.shape_cast %428 : vector<1x2x256xf32> to vector<2x256xf32>
    %430 = vector.broadcast %427 : f32 to vector<2x256xf32>
    %431 = arith.mulf %430, %429 : vector<2x256xf32>
    %432 = arith.addf %420, %431 : vector<2x256xf32>
    %c81_219 = arith.constant 81 : index
    %433 = memref.load %arg1[%c81_219] : memref<98xf32, #tpu.memory_space<smem>>
    %c1_220 = arith.constant 1 : index
    %c0_221 = arith.constant 0 : index
    %c68_222 = arith.constant 68 : index
    %434 = vector.load %arg5[%c1_220, %c0_221, %c68_222] : memref<2x2x358xf32, #tpu.memory_space<vmem>>, vector<1x2x256xf32>
    %435 = vector.shape_cast %434 : vector<1x2x256xf32> to vector<2x256xf32>
    %436 = vector.broadcast %433 : f32 to vector<2x256xf32>
    %437 = arith.mulf %436, %435 : vector<2x256xf32>
    %438 = arith.addf %426, %437 : vector<2x256xf32>
    %c88 = arith.constant 88 : index
    %439 = memref.load %arg1[%c88] : memref<98xf32, #tpu.memory_space<smem>>
    %c1_223 = arith.constant 1 : index
    %c0_224 = arith.constant 0 : index
    %c84_225 = arith.constant 84 : index
    %440 = vector.load %arg5[%c1_223, %c0_224, %c84_225] : memref<2x2x358xf32, #tpu.memory_space<vmem>>, vector<1x2x256xf32>
    %441 = vector.shape_cast %440 : vector<1x2x256xf32> to vector<2x256xf32>
    %442 = vector.broadcast %439 : f32 to vector<2x256xf32>
    %443 = arith.mulf %442, %441 : vector<2x256xf32>
    %444 = arith.addf %432, %443 : vector<2x256xf32>
    %c95 = arith.constant 95 : index
    %445 = memref.load %arg1[%c95] : memref<98xf32, #tpu.memory_space<smem>>
    %c1_226 = arith.constant 1 : index
    %c0_227 = arith.constant 0 : index
    %c100_228 = arith.constant 100 : index
    %446 = vector.load %arg5[%c1_226, %c0_227, %c100_228] : memref<2x2x358xf32, #tpu.memory_space<vmem>>, vector<1x2x256xf32>
    %447 = vector.shape_cast %446 : vector<1x2x256xf32> to vector<2x256xf32>
    %448 = vector.broadcast %445 : f32 to vector<2x256xf32>
    %449 = arith.mulf %448, %447 : vector<2x256xf32>
    %450 = arith.addf %438, %449 : vector<2x256xf32>
    %c4_229 = arith.constant 4 : index
    %c0_230 = arith.constant 0 : index
    %451 = vector.load %arg2[%c4_229, %c0_230] : memref<7x256xf32, #tpu.memory_space<vmem>>, vector<1x256xf32>
    %452 = arith.addf %450, %444 : vector<2x256xf32>
    %453 = vector.broadcast %451 : vector<1x256xf32> to vector<2x256xf32>
    %454 = arith.mulf %453, %452 : vector<2x256xf32>
    %c5 = arith.constant 5 : index
    %455 = memref.load %arg1[%c5] : memref<98xf32, #tpu.memory_space<smem>>
    %c0_231 = arith.constant 0 : index
    %c0_232 = arith.constant 0 : index
    %c5_233 = arith.constant 5 : index
    %456 = vector.load %arg5[%c0_231, %c0_232, %c5_233] : memref<2x2x358xf32, #tpu.memory_space<vmem>>, vector<1x2x256xf32>
    %457 = vector.shape_cast %456 : vector<1x2x256xf32> to vector<2x256xf32>
    %458 = vector.broadcast %455 : f32 to vector<2x256xf32>
    %459 = arith.mulf %458, %457 : vector<2x256xf32>
    %c12 = arith.constant 12 : index
    %460 = memref.load %arg1[%c12] : memref<98xf32, #tpu.memory_space<smem>>
    %c0_234 = arith.constant 0 : index
    %c0_235 = arith.constant 0 : index
    %c21_236 = arith.constant 21 : index
    %461 = vector.load %arg5[%c0_234, %c0_235, %c21_236] : memref<2x2x358xf32, #tpu.memory_space<vmem>>, vector<1x2x256xf32>
    %462 = vector.shape_cast %461 : vector<1x2x256xf32> to vector<2x256xf32>
    %463 = vector.broadcast %460 : f32 to vector<2x256xf32>
    %464 = arith.mulf %463, %462 : vector<2x256xf32>
    %c19_237 = arith.constant 19 : index
    %465 = memref.load %arg1[%c19_237] : memref<98xf32, #tpu.memory_space<smem>>
    %c0_238 = arith.constant 0 : index
    %c0_239 = arith.constant 0 : index
    %c37_240 = arith.constant 37 : index
    %466 = vector.load %arg5[%c0_238, %c0_239, %c37_240] : memref<2x2x358xf32, #tpu.memory_space<vmem>>, vector<1x2x256xf32>
    %467 = vector.shape_cast %466 : vector<1x2x256xf32> to vector<2x256xf32>
    %468 = vector.broadcast %465 : f32 to vector<2x256xf32>
    %469 = arith.mulf %468, %467 : vector<2x256xf32>
    %470 = arith.addf %459, %469 : vector<2x256xf32>
    %c26 = arith.constant 26 : index
    %471 = memref.load %arg1[%c26] : memref<98xf32, #tpu.memory_space<smem>>
    %c0_241 = arith.constant 0 : index
    %c0_242 = arith.constant 0 : index
    %c53_243 = arith.constant 53 : index
    %472 = vector.load %arg5[%c0_241, %c0_242, %c53_243] : memref<2x2x358xf32, #tpu.memory_space<vmem>>, vector<1x2x256xf32>
    %473 = vector.shape_cast %472 : vector<1x2x256xf32> to vector<2x256xf32>
    %474 = vector.broadcast %471 : f32 to vector<2x256xf32>
    %475 = arith.mulf %474, %473 : vector<2x256xf32>
    %476 = arith.addf %464, %475 : vector<2x256xf32>
    %c33_244 = arith.constant 33 : index
    %477 = memref.load %arg1[%c33_244] : memref<98xf32, #tpu.memory_space<smem>>
    %c0_245 = arith.constant 0 : index
    %c0_246 = arith.constant 0 : index
    %c69 = arith.constant 69 : index
    %478 = vector.load %arg5[%c0_245, %c0_246, %c69] : memref<2x2x358xf32, #tpu.memory_space<vmem>>, vector<1x2x256xf32>
    %479 = vector.shape_cast %478 : vector<1x2x256xf32> to vector<2x256xf32>
    %480 = vector.broadcast %477 : f32 to vector<2x256xf32>
    %481 = arith.mulf %480, %479 : vector<2x256xf32>
    %482 = arith.addf %470, %481 : vector<2x256xf32>
    %c40 = arith.constant 40 : index
    %483 = memref.load %arg1[%c40] : memref<98xf32, #tpu.memory_space<smem>>
    %c0_247 = arith.constant 0 : index
    %c0_248 = arith.constant 0 : index
    %c85_249 = arith.constant 85 : index
    %484 = vector.load %arg5[%c0_247, %c0_248, %c85_249] : memref<2x2x358xf32, #tpu.memory_space<vmem>>, vector<1x2x256xf32>
    %485 = vector.shape_cast %484 : vector<1x2x256xf32> to vector<2x256xf32>
    %486 = vector.broadcast %483 : f32 to vector<2x256xf32>
    %487 = arith.mulf %486, %485 : vector<2x256xf32>
    %488 = arith.addf %476, %487 : vector<2x256xf32>
    %c47 = arith.constant 47 : index
    %489 = memref.load %arg1[%c47] : memref<98xf32, #tpu.memory_space<smem>>
    %c0_250 = arith.constant 0 : index
    %c0_251 = arith.constant 0 : index
    %c101 = arith.constant 101 : index
    %490 = vector.load %arg5[%c0_250, %c0_251, %c101] : memref<2x2x358xf32, #tpu.memory_space<vmem>>, vector<1x2x256xf32>
    %491 = vector.shape_cast %490 : vector<1x2x256xf32> to vector<2x256xf32>
    %492 = vector.broadcast %489 : f32 to vector<2x256xf32>
    %493 = arith.mulf %492, %491 : vector<2x256xf32>
    %494 = arith.addf %482, %493 : vector<2x256xf32>
    %c54 = arith.constant 54 : index
    %495 = memref.load %arg1[%c54] : memref<98xf32, #tpu.memory_space<smem>>
    %c1_252 = arith.constant 1 : index
    %c0_253 = arith.constant 0 : index
    %c5_254 = arith.constant 5 : index
    %496 = vector.load %arg5[%c1_252, %c0_253, %c5_254] : memref<2x2x358xf32, #tpu.memory_space<vmem>>, vector<1x2x256xf32>
    %497 = vector.shape_cast %496 : vector<1x2x256xf32> to vector<2x256xf32>
    %498 = vector.broadcast %495 : f32 to vector<2x256xf32>
    %499 = arith.mulf %498, %497 : vector<2x256xf32>
    %500 = arith.addf %494, %499 : vector<2x256xf32>
    %c61 = arith.constant 61 : index
    %501 = memref.load %arg1[%c61] : memref<98xf32, #tpu.memory_space<smem>>
    %c1_255 = arith.constant 1 : index
    %c0_256 = arith.constant 0 : index
    %c21_257 = arith.constant 21 : index
    %502 = vector.load %arg5[%c1_255, %c0_256, %c21_257] : memref<2x2x358xf32, #tpu.memory_space<vmem>>, vector<1x2x256xf32>
    %503 = vector.shape_cast %502 : vector<1x2x256xf32> to vector<2x256xf32>
    %504 = vector.broadcast %501 : f32 to vector<2x256xf32>
    %505 = arith.mulf %504, %503 : vector<2x256xf32>
    %506 = arith.addf %488, %505 : vector<2x256xf32>
    %c68_258 = arith.constant 68 : index
    %507 = memref.load %arg1[%c68_258] : memref<98xf32, #tpu.memory_space<smem>>
    %c1_259 = arith.constant 1 : index
    %c0_260 = arith.constant 0 : index
    %c37_261 = arith.constant 37 : index
    %508 = vector.load %arg5[%c1_259, %c0_260, %c37_261] : memref<2x2x358xf32, #tpu.memory_space<vmem>>, vector<1x2x256xf32>
    %509 = vector.shape_cast %508 : vector<1x2x256xf32> to vector<2x256xf32>
    %510 = vector.broadcast %507 : f32 to vector<2x256xf32>
    %511 = arith.mulf %510, %509 : vector<2x256xf32>
    %512 = arith.addf %500, %511 : vector<2x256xf32>
    %c75 = arith.constant 75 : index
    %513 = memref.load %arg1[%c75] : memref<98xf32, #tpu.memory_space<smem>>
    %c1_262 = arith.constant 1 : index
    %c0_263 = arith.constant 0 : index
    %c53_264 = arith.constant 53 : index
    %514 = vector.load %arg5[%c1_262, %c0_263, %c53_264] : memref<2x2x358xf32, #tpu.memory_space<vmem>>, vector<1x2x256xf32>
    %515 = vector.shape_cast %514 : vector<1x2x256xf32> to vector<2x256xf32>
    %516 = vector.broadcast %513 : f32 to vector<2x256xf32>
    %517 = arith.mulf %516, %515 : vector<2x256xf32>
    %518 = arith.addf %506, %517 : vector<2x256xf32>
    %c82_265 = arith.constant 82 : index
    %519 = memref.load %arg1[%c82_265] : memref<98xf32, #tpu.memory_space<smem>>
    %c1_266 = arith.constant 1 : index
    %c0_267 = arith.constant 0 : index
    %c69_268 = arith.constant 69 : index
    %520 = vector.load %arg5[%c1_266, %c0_267, %c69_268] : memref<2x2x358xf32, #tpu.memory_space<vmem>>, vector<1x2x256xf32>
    %521 = vector.shape_cast %520 : vector<1x2x256xf32> to vector<2x256xf32>
    %522 = vector.broadcast %519 : f32 to vector<2x256xf32>
    %523 = arith.mulf %522, %521 : vector<2x256xf32>
    %524 = arith.addf %512, %523 : vector<2x256xf32>
    %c89 = arith.constant 89 : index
    %525 = memref.load %arg1[%c89] : memref<98xf32, #tpu.memory_space<smem>>
    %c1_269 = arith.constant 1 : index
    %c0_270 = arith.constant 0 : index
    %c85_271 = arith.constant 85 : index
    %526 = vector.load %arg5[%c1_269, %c0_270, %c85_271] : memref<2x2x358xf32, #tpu.memory_space<vmem>>, vector<1x2x256xf32>
    %527 = vector.shape_cast %526 : vector<1x2x256xf32> to vector<2x256xf32>
    %528 = vector.broadcast %525 : f32 to vector<2x256xf32>
    %529 = arith.mulf %528, %527 : vector<2x256xf32>
    %530 = arith.addf %518, %529 : vector<2x256xf32>
    %c96_272 = arith.constant 96 : index
    %531 = memref.load %arg1[%c96_272] : memref<98xf32, #tpu.memory_space<smem>>
    %c1_273 = arith.constant 1 : index
    %c0_274 = arith.constant 0 : index
    %c101_275 = arith.constant 101 : index
    %532 = vector.load %arg5[%c1_273, %c0_274, %c101_275] : memref<2x2x358xf32, #tpu.memory_space<vmem>>, vector<1x2x256xf32>
    %533 = vector.shape_cast %532 : vector<1x2x256xf32> to vector<2x256xf32>
    %534 = vector.broadcast %531 : f32 to vector<2x256xf32>
    %535 = arith.mulf %534, %533 : vector<2x256xf32>
    %536 = arith.addf %524, %535 : vector<2x256xf32>
    %c5_276 = arith.constant 5 : index
    %c0_277 = arith.constant 0 : index
    %537 = vector.load %arg2[%c5_276, %c0_277] : memref<7x256xf32, #tpu.memory_space<vmem>>, vector<1x256xf32>
    %538 = arith.addf %536, %530 : vector<2x256xf32>
    %539 = vector.broadcast %537 : vector<1x256xf32> to vector<2x256xf32>
    %540 = arith.mulf %539, %538 : vector<2x256xf32>
    %c6 = arith.constant 6 : index
    %541 = memref.load %arg1[%c6] : memref<98xf32, #tpu.memory_space<smem>>
    %c0_278 = arith.constant 0 : index
    %c0_279 = arith.constant 0 : index
    %c6_280 = arith.constant 6 : index
    %542 = vector.load %arg5[%c0_278, %c0_279, %c6_280] : memref<2x2x358xf32, #tpu.memory_space<vmem>>, vector<1x2x256xf32>
    %543 = vector.shape_cast %542 : vector<1x2x256xf32> to vector<2x256xf32>
    %544 = vector.broadcast %541 : f32 to vector<2x256xf32>
    %545 = arith.mulf %544, %543 : vector<2x256xf32>
    %c13 = arith.constant 13 : index
    %546 = memref.load %arg1[%c13] : memref<98xf32, #tpu.memory_space<smem>>
    %c0_281 = arith.constant 0 : index
    %c0_282 = arith.constant 0 : index
    %c22_283 = arith.constant 22 : index
    %547 = vector.load %arg5[%c0_281, %c0_282, %c22_283] : memref<2x2x358xf32, #tpu.memory_space<vmem>>, vector<1x2x256xf32>
    %548 = vector.shape_cast %547 : vector<1x2x256xf32> to vector<2x256xf32>
    %549 = vector.broadcast %546 : f32 to vector<2x256xf32>
    %550 = arith.mulf %549, %548 : vector<2x256xf32>
    %c20_284 = arith.constant 20 : index
    %551 = memref.load %arg1[%c20_284] : memref<98xf32, #tpu.memory_space<smem>>
    %c0_285 = arith.constant 0 : index
    %c0_286 = arith.constant 0 : index
    %c38_287 = arith.constant 38 : index
    %552 = vector.load %arg5[%c0_285, %c0_286, %c38_287] : memref<2x2x358xf32, #tpu.memory_space<vmem>>, vector<1x2x256xf32>
    %553 = vector.shape_cast %552 : vector<1x2x256xf32> to vector<2x256xf32>
    %554 = vector.broadcast %551 : f32 to vector<2x256xf32>
    %555 = arith.mulf %554, %553 : vector<2x256xf32>
    %556 = arith.addf %545, %555 : vector<2x256xf32>
    %c27 = arith.constant 27 : index
    %557 = memref.load %arg1[%c27] : memref<98xf32, #tpu.memory_space<smem>>
    %c0_288 = arith.constant 0 : index
    %c0_289 = arith.constant 0 : index
    %c54_290 = arith.constant 54 : index
    %558 = vector.load %arg5[%c0_288, %c0_289, %c54_290] : memref<2x2x358xf32, #tpu.memory_space<vmem>>, vector<1x2x256xf32>
    %559 = vector.shape_cast %558 : vector<1x2x256xf32> to vector<2x256xf32>
    %560 = vector.broadcast %557 : f32 to vector<2x256xf32>
    %561 = arith.mulf %560, %559 : vector<2x256xf32>
    %562 = arith.addf %550, %561 : vector<2x256xf32>
    %c34_291 = arith.constant 34 : index
    %563 = memref.load %arg1[%c34_291] : memref<98xf32, #tpu.memory_space<smem>>
    %c0_292 = arith.constant 0 : index
    %c0_293 = arith.constant 0 : index
    %c70_294 = arith.constant 70 : index
    %564 = vector.load %arg5[%c0_292, %c0_293, %c70_294] : memref<2x2x358xf32, #tpu.memory_space<vmem>>, vector<1x2x256xf32>
    %565 = vector.shape_cast %564 : vector<1x2x256xf32> to vector<2x256xf32>
    %566 = vector.broadcast %563 : f32 to vector<2x256xf32>
    %567 = arith.mulf %566, %565 : vector<2x256xf32>
    %568 = arith.addf %556, %567 : vector<2x256xf32>
    %c41 = arith.constant 41 : index
    %569 = memref.load %arg1[%c41] : memref<98xf32, #tpu.memory_space<smem>>
    %c0_295 = arith.constant 0 : index
    %c0_296 = arith.constant 0 : index
    %c86_297 = arith.constant 86 : index
    %570 = vector.load %arg5[%c0_295, %c0_296, %c86_297] : memref<2x2x358xf32, #tpu.memory_space<vmem>>, vector<1x2x256xf32>
    %571 = vector.shape_cast %570 : vector<1x2x256xf32> to vector<2x256xf32>
    %572 = vector.broadcast %569 : f32 to vector<2x256xf32>
    %573 = arith.mulf %572, %571 : vector<2x256xf32>
    %574 = arith.addf %562, %573 : vector<2x256xf32>
    %c48_298 = arith.constant 48 : index
    %575 = memref.load %arg1[%c48_298] : memref<98xf32, #tpu.memory_space<smem>>
    %c0_299 = arith.constant 0 : index
    %c0_300 = arith.constant 0 : index
    %c102 = arith.constant 102 : index
    %576 = vector.load %arg5[%c0_299, %c0_300, %c102] : memref<2x2x358xf32, #tpu.memory_space<vmem>>, vector<1x2x256xf32>
    %577 = vector.shape_cast %576 : vector<1x2x256xf32> to vector<2x256xf32>
    %578 = vector.broadcast %575 : f32 to vector<2x256xf32>
    %579 = arith.mulf %578, %577 : vector<2x256xf32>
    %580 = arith.addf %568, %579 : vector<2x256xf32>
    %c55 = arith.constant 55 : index
    %581 = memref.load %arg1[%c55] : memref<98xf32, #tpu.memory_space<smem>>
    %c1_301 = arith.constant 1 : index
    %c0_302 = arith.constant 0 : index
    %c6_303 = arith.constant 6 : index
    %582 = vector.load %arg5[%c1_301, %c0_302, %c6_303] : memref<2x2x358xf32, #tpu.memory_space<vmem>>, vector<1x2x256xf32>
    %583 = vector.shape_cast %582 : vector<1x2x256xf32> to vector<2x256xf32>
    %584 = vector.broadcast %581 : f32 to vector<2x256xf32>
    %585 = arith.mulf %584, %583 : vector<2x256xf32>
    %586 = arith.addf %580, %585 : vector<2x256xf32>
    %c62 = arith.constant 62 : index
    %587 = memref.load %arg1[%c62] : memref<98xf32, #tpu.memory_space<smem>>
    %c1_304 = arith.constant 1 : index
    %c0_305 = arith.constant 0 : index
    %c22_306 = arith.constant 22 : index
    %588 = vector.load %arg5[%c1_304, %c0_305, %c22_306] : memref<2x2x358xf32, #tpu.memory_space<vmem>>, vector<1x2x256xf32>
    %589 = vector.shape_cast %588 : vector<1x2x256xf32> to vector<2x256xf32>
    %590 = vector.broadcast %587 : f32 to vector<2x256xf32>
    %591 = arith.mulf %590, %589 : vector<2x256xf32>
    %592 = arith.addf %574, %591 : vector<2x256xf32>
    %c69_307 = arith.constant 69 : index
    %593 = memref.load %arg1[%c69_307] : memref<98xf32, #tpu.memory_space<smem>>
    %c1_308 = arith.constant 1 : index
    %c0_309 = arith.constant 0 : index
    %c38_310 = arith.constant 38 : index
    %594 = vector.load %arg5[%c1_308, %c0_309, %c38_310] : memref<2x2x358xf32, #tpu.memory_space<vmem>>, vector<1x2x256xf32>
    %595 = vector.shape_cast %594 : vector<1x2x256xf32> to vector<2x256xf32>
    %596 = vector.broadcast %593 : f32 to vector<2x256xf32>
    %597 = arith.mulf %596, %595 : vector<2x256xf32>
    %598 = arith.addf %586, %597 : vector<2x256xf32>
    %c76 = arith.constant 76 : index
    %599 = memref.load %arg1[%c76] : memref<98xf32, #tpu.memory_space<smem>>
    %c1_311 = arith.constant 1 : index
    %c0_312 = arith.constant 0 : index
    %c54_313 = arith.constant 54 : index
    %600 = vector.load %arg5[%c1_311, %c0_312, %c54_313] : memref<2x2x358xf32, #tpu.memory_space<vmem>>, vector<1x2x256xf32>
    %601 = vector.shape_cast %600 : vector<1x2x256xf32> to vector<2x256xf32>
    %602 = vector.broadcast %599 : f32 to vector<2x256xf32>
    %603 = arith.mulf %602, %601 : vector<2x256xf32>
    %604 = arith.addf %592, %603 : vector<2x256xf32>
    %c83_314 = arith.constant 83 : index
    %605 = memref.load %arg1[%c83_314] : memref<98xf32, #tpu.memory_space<smem>>
    %c1_315 = arith.constant 1 : index
    %c0_316 = arith.constant 0 : index
    %c70_317 = arith.constant 70 : index
    %606 = vector.load %arg5[%c1_315, %c0_316, %c70_317] : memref<2x2x358xf32, #tpu.memory_space<vmem>>, vector<1x2x256xf32>
    %607 = vector.shape_cast %606 : vector<1x2x256xf32> to vector<2x256xf32>
    %608 = vector.broadcast %605 : f32 to vector<2x256xf32>
    %609 = arith.mulf %608, %607 : vector<2x256xf32>
    %610 = arith.addf %598, %609 : vector<2x256xf32>
    %c90 = arith.constant 90 : index
    %611 = memref.load %arg1[%c90] : memref<98xf32, #tpu.memory_space<smem>>
    %c1_318 = arith.constant 1 : index
    %c0_319 = arith.constant 0 : index
    %c86_320 = arith.constant 86 : index
    %612 = vector.load %arg5[%c1_318, %c0_319, %c86_320] : memref<2x2x358xf32, #tpu.memory_space<vmem>>, vector<1x2x256xf32>
    %613 = vector.shape_cast %612 : vector<1x2x256xf32> to vector<2x256xf32>
    %614 = vector.broadcast %611 : f32 to vector<2x256xf32>
    %615 = arith.mulf %614, %613 : vector<2x256xf32>
    %616 = arith.addf %604, %615 : vector<2x256xf32>
    %c97_321 = arith.constant 97 : index
    %617 = memref.load %arg1[%c97_321] : memref<98xf32, #tpu.memory_space<smem>>
    %c1_322 = arith.constant 1 : index
    %c0_323 = arith.constant 0 : index
    %c102_324 = arith.constant 102 : index
    %618 = vector.load %arg5[%c1_322, %c0_323, %c102_324] : memref<2x2x358xf32, #tpu.memory_space<vmem>>, vector<1x2x256xf32>
    %619 = vector.shape_cast %618 : vector<1x2x256xf32> to vector<2x256xf32>
    %620 = vector.broadcast %617 : f32 to vector<2x256xf32>
    %621 = arith.mulf %620, %619 : vector<2x256xf32>
    %622 = arith.addf %610, %621 : vector<2x256xf32>
    %c6_325 = arith.constant 6 : index
    %c0_326 = arith.constant 0 : index
    %623 = vector.load %arg2[%c6_325, %c0_326] : memref<7x256xf32, #tpu.memory_space<vmem>>, vector<1x256xf32>
    %624 = arith.addf %622, %616 : vector<2x256xf32>
    %625 = vector.broadcast %623 : vector<1x256xf32> to vector<2x256xf32>
    %626 = arith.mulf %625, %624 : vector<2x256xf32>
    %627 = arith.addf %110, %196 : vector<2x256xf32>
    %628 = arith.addf %282, %368 : vector<2x256xf32>
    %629 = arith.addf %454, %540 : vector<2x256xf32>
    %630 = arith.addf %627, %628 : vector<2x256xf32>
    %631 = arith.addf %629, %626 : vector<2x256xf32>
    %632 = arith.addf %630, %631 : vector<2x256xf32>
    %633 = arith.negf %632 : vector<2x256xf32>
    %634 = math.exp %633 : vector<2x256xf32>
    %cst_327 = arith.constant 1.000000e+00 : f32
    %635 = vector.broadcast %cst_327 : f32 to vector<2x256xf32>
    %636 = arith.addf %635, %634 : vector<2x256xf32>
    %637 = arith.divf %635, %636 : vector<2x256xf32>
    %c0_328 = arith.constant 0 : index
    %c0_329 = arith.constant 0 : index
    %c0_330 = arith.constant 0 : index
    %638 = vector.load %arg3[%c0_328, %c0_329, %c0_330] : memref<2x4x256xf32, #tpu.memory_space<vmem>>, vector<2x1x256xf32>
    %639 = vector.shape_cast %638 : vector<2x1x256xf32> to vector<2x256xf32>
    %640 = arith.mulf %639, %637 : vector<2x256xf32>
    %c0_331 = arith.constant 0 : index
    %c0_332 = arith.constant 0 : index
    %c0_333 = arith.constant 0 : index
    %641 = vector.load %arg4[%c0_331, %c0_332, %c0_333] : memref<2x4x256xf32, #tpu.memory_space<vmem>>, vector<2x1x256xf32>
    %642 = vector.shape_cast %641 : vector<2x1x256xf32> to vector<2x256xf32>
    %643 = vector.shape_cast %640 : vector<2x256xf32> to vector<2x1x256xf32>
    tpu.vector_store %arg4[%c0_331, %c0_332, %c0_333], %643 {strides = array<i32>} : memref<2x4x256xf32, #tpu.memory_space<vmem>>, vector<2x1x256xf32>,
    %c0_334 = arith.constant 0 : index
    %c1_335 = arith.constant 1 : index
    %c0_336 = arith.constant 0 : index
    %644 = vector.load %arg3[%c0_334, %c1_335, %c0_336] : memref<2x4x256xf32, #tpu.memory_space<vmem>>, vector<2x1x256xf32>
    %645 = vector.shape_cast %644 : vector<2x1x256xf32> to vector<2x256xf32>
    %646 = arith.mulf %645, %637 : vector<2x256xf32>
    %c0_337 = arith.constant 0 : index
    %c1_338 = arith.constant 1 : index
    %c0_339 = arith.constant 0 : index
    %647 = vector.load %arg4[%c0_337, %c1_338, %c0_339] : memref<2x4x256xf32, #tpu.memory_space<vmem>>, vector<2x1x256xf32>
    %648 = vector.shape_cast %647 : vector<2x1x256xf32> to vector<2x256xf32>
    %649 = vector.shape_cast %646 : vector<2x256xf32> to vector<2x1x256xf32>
    tpu.vector_store %arg4[%c0_337, %c1_338, %c0_339], %649 {strides = array<i32>} : memref<2x4x256xf32, #tpu.memory_space<vmem>>, vector<2x1x256xf32>,
    %c0_340 = arith.constant 0 : index
    %c2_341 = arith.constant 2 : index
    %c0_342 = arith.constant 0 : index
    %650 = vector.load %arg3[%c0_340, %c2_341, %c0_342] : memref<2x4x256xf32, #tpu.memory_space<vmem>>, vector<2x1x256xf32>
    %651 = vector.shape_cast %650 : vector<2x1x256xf32> to vector<2x256xf32>
    %652 = arith.mulf %651, %637 : vector<2x256xf32>
    %c0_343 = arith.constant 0 : index
    %c2_344 = arith.constant 2 : index
    %c0_345 = arith.constant 0 : index
    %653 = vector.load %arg4[%c0_343, %c2_344, %c0_345] : memref<2x4x256xf32, #tpu.memory_space<vmem>>, vector<2x1x256xf32>
    %654 = vector.shape_cast %653 : vector<2x1x256xf32> to vector<2x256xf32>
    %655 = vector.shape_cast %652 : vector<2x256xf32> to vector<2x1x256xf32>
    tpu.vector_store %arg4[%c0_343, %c2_344, %c0_345], %655 {strides = array<i32>} : memref<2x4x256xf32, #tpu.memory_space<vmem>>, vector<2x1x256xf32>,
    %c0_346 = arith.constant 0 : index
    %c3_347 = arith.constant 3 : index
    %c0_348 = arith.constant 0 : index
    %656 = vector.load %arg3[%c0_346, %c3_347, %c0_348] : memref<2x4x256xf32, #tpu.memory_space<vmem>>, vector<2x1x256xf32>
    %657 = vector.shape_cast %656 : vector<2x1x256xf32> to vector<2x256xf32>
    %658 = arith.mulf %657, %637 : vector<2x256xf32>
    %c0_349 = arith.constant 0 : index
    %c3_350 = arith.constant 3 : index
    %c0_351 = arith.constant 0 : index
    %659 = vector.load %arg4[%c0_349, %c3_350, %c0_351] : memref<2x4x256xf32, #tpu.memory_space<vmem>>, vector<2x1x256xf32>
    %660 = vector.shape_cast %659 : vector<2x1x256xf32> to vector<2x256xf32>
    %661 = vector.shape_cast %658 : vector<2x256xf32> to vector<2x1x256xf32>
    tpu.vector_store %arg4[%c0_349, %c3_350, %c0_351], %661 {strides = array<i32>} : memref<2x4x256xf32, #tpu.memory_space<vmem>>, vector<2x1x256xf32>,
    return
  }
  func.func @transform_0(%arg0: i32) -> i32 {
    %c0_i32 = arith.constant 0 : i32
    %c0_i32_0 = arith.constant 0 : i32
    return %c0_i32 : i32
  }
  func.func @transform_1(%arg0: i32) -> (i32, i32) {
    %c0_i32 = arith.constant 0 : i32
    %c0_i32_0 = arith.constant 0 : i32
    %c0_i32_1 = arith.constant 0 : i32
    return %c0_i32, %c0_i32_0 : i32, i32
  }
  func.func @transform_2(%arg0: i32) -> (i32, i32, i32) {
    %c0_i32 = arith.constant 0 : i32
    %c0_i32_0 = arith.constant 0 : i32
    %c0_i32_1 = arith.constant 0 : i32
    return %arg0, %c0_i32, %c0_i32_0 : i32, i32, i32
  }
  func.func @transform_3(%arg0: i32) -> (i32, i32, i32) {
    %c0_i32 = arith.constant 0 : i32
    %c0_i32_0 = arith.constant 0 : i32
    %c0_i32_1 = arith.constant 0 : i32
    return %arg0, %c0_i32, %c0_i32_0 : i32, i32, i32
  }
}

</mosaic_0001>

<bundles_post_ra>
// kernel: tpu_custom_call.1
= control target key start
LH: loop header
LB: loop body
LE: loop exit
PB: predicated region body
PF: predicated region fallthrough
CT: control target
= control target key end

     0   :  { %8 = vsyncpa [#allocation6], 0  ;;  %s2278_s0 = inlined_call_operand.hbm [shape: f32[98], index: 0, kind: input, shape index: {}]   ;;  %s2279_s1 = inlined_call_operand.hbm [shape: f32[7,256], index: 1, kind: input, shape index: {}]   ;;  %s2280_s2 = inlined_call_operand.hbm [shape: f32[2,4,256], index: 2, kind: input, shape index: {}]   ;;  %s2281_s3 = inlined_call_operand.hbm [shape: f32[2,4,256], index: 3, kind: output, shape index: {}]  }
   0x1   :  { %9 = vsyncpa [#allocation4], 0 }
   0x2   :  { %10 = vsyncpa [#allocation9], 0 }
   0x3   :  { %11 = vsyncpa [#allocation5], 0  ;;  %s1590_s12 = smov [#allocation3]   ;;  %s1591_s15 = smov [#allocation7]  }
   0x4   :  { %19 = dma.hbm_to_smem %s2278_s0, 16, %s1590_s12, [#allocation6]  }
   0x5   :  { %s26_s16 = sshll.u32 %s1591_s15, 4  ;;  %s1592_s17 = smov [#allocation8]   ;;  %s27_s16 = int_to_ptr.vmem [resolvable:$true] %s26_s16 }
   0x6   :  { %s35_s18 = sshll.u32 %s1592_s17, 4  ;;  %s1530_s19 = scalar_lea.vmem %s27_s16, 256  ;;  %s36_s18 = int_to_ptr.vmem [resolvable:$true] %s35_s18 }
   0x7   :  { %p1531_p0 = scmp.ne.s32.totalorder %s27_s16, %s1530_s19  ;;  %p1535_p1 = scmp.lt.s32.totalorder %s27_s16, %s27_s16 }
   0x8   :  { %p1536_p2 = scmp.lt.s32.totalorder %s1530_s19, %s1530_s19 }
   0xa   :  { %p1537_p3 = por %p1536_p2, %p1535_p1 }
   0xc   :  { %p1538_p4 = pnand %p1537_p3, %p1531_p0 }
   0xe   :  { %1541 = shalt.err (!%p1538_p4)
}
   0xf   :  { %29 = dma.hbm_to_vmem [thread:$0]  %s2279_s1, 256, %s27_s16, [#allocation4]  }
  0x10   :  { %s1550_s22 = scalar_lea.vmem %s36_s18, 256  ;;  %p1555_p6 = scmp.lt.s32.totalorder %s36_s18, %s36_s18 }
  0x11   :  { %p1551_p5 = scmp.ne.s32.totalorder %s36_s18, %s1550_s22  ;;  %p1556_p7 = scmp.lt.s32.totalorder %s1550_s22, %s1550_s22 }
  0x13   :  { %p1557_p8 = por %p1556_p7, %p1555_p6 }
  0x15   :  { %p1558_p9 = pnand %p1557_p8, %p1551_p5 }
  0x17   :  { %1561 = shalt.err (!%p1558_p9)
}
  0x18   :  { %s1593_s0 = smov 128   ;;  %s1594_s23 = smov 8  }
  0x19   :  { %41 = dma.hbm_to_vmem [thread:$0]  %s2280_s2, 256, %s36_s18, [#allocation9], %s1593_s0, %s1593_s0, %s1594_s23  }
  0x1a   :  { %1582 = dma.done.wait [#allocation6], 16  }
  0x1b   :  { %1583 = vsyncadd [#allocation6], 4294967280 }
  0x1c   :  { %1584 = dma.done.wait [#allocation4], 256  }
  0x1d   :  { %1585 = vsyncadd [#allocation4], 4294967040 }
  0x1e   :  { %1586 = dma.done.wait [#allocation9], 256  }
  0x1f   :  { %1587 = vsyncadd [#allocation9], 4294967040 }
  0x20   :  { %51 = sfence }
  0x21   :  { %v52_v0 = vld [vmem:[#allocation8] ss:$4 sm:$0x3]  ;;  %v54_v1 = vld [vmem:[#allocation8 + $0x8] ss:$4 sm:$0x3]  ;;  %v2282_v4 = vlaneseq }
  0x22   :  { %v56_v2 = vld [vmem:[#allocation8 + $0x1] ss:$4 sm:$0x3]  ;;  %v58_v3 = vld [vmem:[#allocation8 + $0x9] ss:$4 sm:$0x3] }
  0x23   :  { %v60_v5 = vld [vmem:[#allocation8 + $0x2] ss:$4 sm:$0x3]  ;;  %v62_v6 = vld [vmem:[#allocation8 + $0xa] ss:$4 sm:$0x3]  ;;  %v67_v7 = vadd.f32 %v56_v2, %v52_v0  ;;  %v68_v8 = vadd.f32 %v58_v3, %v54_v1  ;;  %v73_v16 = vmax.f32 %v52_v0, %v56_v2  ;;  %v74_v19 = vmax.f32 %v54_v1, %v58_v3 }
  0x24   :  { %v64_v9 = vld [vmem:[#allocation8 + $0x3] ss:$4 sm:$0x3]  ;;  %v66_v10 = vld [vmem:[#allocation8 + $0xb] ss:$4 sm:$0x3] }
  0x25   :  { %v69_v11 = vadd.f32 %v64_v9, %v60_v5  ;;  %v70_v12 = vadd.f32 %v66_v10, %v62_v6  ;;  %v1595_v13 = vmov 1935823168   ;;  %v1644_v15 = vshrl.u32 %v2282_v4, 7  ;;  %s1597_s1 = smov 51   ;;  %s1418_s2 = sld [smem:[#allocation3 + $0x48]] }
  0x26   :  { %v91_v14 = vunpack.c.l.s4 %v1595_v13  ;;  %v75_v21 = vmax.f32 %v60_v5, %v64_v9  ;;  %v76_v24 = vmax.f32 %v62_v6, %v66_v10  ;;  %vm81_vm0 = vcmask 410624   ;;  %s1404_s26 = sld [smem:[#allocation3 + $0x47]]  ;;  %s1598_s6 = smov 96  }
  0x27   :  { %2288 = vst [vmem:[#allocation15_spill] sm:$0xff] %v1644_v15  ;;  %v71_v17 = vadd.f32 %v69_v11, %v67_v7  ;;  %v72_v18 = vadd.f32 %v70_v12, %v68_v8  ;;  %vm84_vm1 = vcmask 828824   ;;  %v1596_v29 = vmov 0.0   ;;  %s1446_s27 = sld [smem:[#allocation3 + $0x4a]]  ;;  %s1599_s11 = smov 64  }
  0x28   :  { %v92_v20 = vunpack.c.0.s8 %v91_v14  ;;  %v77_v26 = vmax.f32 %v73_v16, %v75_v21  ;;  %v78_v28 = vmax.f32 %v74_v19, %v76_v24  ;;  %82 = vst.msk [vmem:[#allocation2] sm:$0x3] %vm81_vm0, %v1596_v29  ;;  %83 = vst.msk [vmem:[#allocation2 + $0x6] sm:$0x3] %vm81_vm0, %v1596_v29  ;;  %vm103_vm2 = vcmask 1041816   ;;  %s1432_s28 = sld [smem:[#allocation3 + $0x49]] }
  0x29   :  { %v79_v22 = vmul.f32 0.25, %v71_v17  ;;  %v80_v23 = vmul.f32 0.25, %v72_v18  ;;  %85 = vst.msk [vmem:[#allocation2 + $0x4] sm:$0x3] %vm84_vm1, %v1596_v29  ;;  %86 = vst.msk [vmem:[#allocation2 + $0xa] sm:$0x3] %vm84_vm1, %v1596_v29 }
  0x2a   :  { %v95_v25 = vsub.s32 %v92_v20, %v1644_v15  ;;  %v111_v31 = vcombine.low %v77_v26, %v78_v28  ;;  %vm104_vm3 = vcmask 1043458   ;;  %vm106_vm5 = vcmask 414724   ;;  %s1406_s29 = sld [smem:[#allocation3 + $0x55]] }
  0x2b   :  { %v89_v27 = vcombine.low %v79_v22, %v80_v23  ;;  %vm105_vm4 = vmor %vm104_vm3, %vm103_vm2  ;;  %vm100_vm6 = vcmask 416768   ;;  %v523_v39 = vstv %s1418_s2  ;;  %s1460_s30 = sld [smem:[#allocation3 + $0x4b]]  ;;  %vm141_vm8 = vcmask 785408  }
  0x2c   :  { %v118_v32 = vrot.slane %v111_v31, %v95_v25  ;;  %vm107_vm7 = vmor %vm106_vm5, %vm105_vm4  ;;  %v357_v40 = vstv %s1404_s26  ;;  %s1434_s4 = sld [smem:[#allocation3 + $0x57]]  ;;  %vm162_vm9 = vcmask 523264   ;;  %vm183_vm10 = vcmask 261120  }
  0x2d   :  { %v96_v30 = vrot.slane %v89_v27, %v95_v25  ;;  %v855_v46 = vstv %s1446_s27  ;;  %s1420_s5 = sld [smem:[#allocation3 + $0x56]]  ;;  %vm252_vm11 = vcmask 916480   ;;  %vm439_vm12 = vcmask 1039360  }
  0x2e   :  { %v689_v48 = vstv %s1432_s28  ;;  %s1462_s7 = sld [smem:[#allocation3 + $0x59]]  ;;  %vm605_vm13 = vcmask 1031168   ;;  %vm771_vm14 = vcmask 1022976   ;;  %vm937_vm15 = vcmask 1014784  }
  0x2f   :  { %97 = vrot.lane.b32.xlu0 %v96_v30, %s1597_s1  ;;  %s1448_s8 = sld [smem:[#allocation3 + $0x58]]  ;;  %vm1269_vm0 = vcmask 998400   ;;  %vm1103_vm1 = vcmask 1006592  }
  0x30   :  { %v377_v51 = vstv %s1406_s29  ;;  %s1476_s9 = sld [smem:[#allocation3 + $0x5a]] }
  0x31   :  { %v1021_v53 = vstv %s1460_s30  ;;  %s1474_s10 = sld [smem:[#allocation3 + $0x4c]] }
  0x32   :  { %v709_v56 = vstv %s1434_s4  ;;  %s1403_s12 = sld [smem:[#allocation3 + $0x40]] }
  0x33   :  { %119 = vrot.lane.b32.xlu0 %v118_v32, %s1597_s1  ;;  %v543_v57 = vstv %s1420_s5  ;;  %s1390_s13 = sld [smem:[#allocation3 + $0x46]] }
  0x34   :  { %v1041_v60 = vstv %s1462_s7  ;;  %s1431_s14 = sld [smem:[#allocation3 + $0x42]] }
  0x35   :  { %v875_v61 = vstv %s1448_s8  ;;  %s1417_s15 = sld [smem:[#allocation3 + $0x41]] }
  0x36   :  { %v1207_v1 = vstv %s1476_s9  ;;  %s1459_s16 = sld [smem:[#allocation3 + $0x44]] }
  0x37   :  { %v1187_v2 = vstv %s1474_s10  ;;  %s1445_s17 = sld [smem:[#allocation3 + $0x43]] }
  0x38   :  { %v347_v6 = vstv %s1403_s12  ;;  %s1405_s18 = sld [smem:[#allocation3 + $0x4e]] }
  0x39   :  { %v208_v8 = vstv %s1390_s13  ;;  %s1392_s19 = sld [smem:[#allocation3 + $0x54]] }
  0x3a   :  { %v679_v11 = vstv %s1431_s14  ;;  %s1433_s20 = sld [smem:[#allocation3 + $0x50]] }
  0x3b   :  { %v513_v12 = vstv %s1417_s15  ;;  %s1419_s21 = sld [smem:[#allocation3 + $0x4f]] }
  0x3c   :  { %v1011_v16 = vstv %s1459_s16  ;;  %s1397_s22 = sld [smem:[#allocation3 + $0x16]] }
  0x3d   :  { %v845_v17 = vstv %s1445_s17  ;;  %s1425_s24 = sld [smem:[#allocation3 + $0x18]] }
  0x3e   :  { %v367_v20 = vstv %s1405_s18  ;;  %s1411_s25 = sld [smem:[#allocation3 + $0x17]]  ;;  %s1600_s18 = smov 32  }
  0x3f   :  { %v228_v21 = vstv %s1392_s19  ;;  %s1453_s1 = sld [smem:[#allocation3 + $0x1a]] }
  0x40   :  { %v699_v24 = vstv %s1433_s20  ;;  %s1439_s2 = sld [smem:[#allocation3 + $0x19]] }
  0x41   :  { %v533_v25 = vstv %s1419_s21  ;;  %s1413_s26 = sld [smem:[#allocation3 + $0x25]] }
  0x42   :  { %v298_v29 = vstv %s1397_s22  ;;  %s1399_s27 = sld [smem:[#allocation3 + $0x24]] }
  0x43   :  { %v630_v31 = vstv %s1425_s24  ;;  %s1441_s28 = sld [smem:[#allocation3 + $0x27]] }
  0x44   :  { %s1427_s29 = sld [smem:[#allocation3 + $0x26]] }
  0x45   :  { %s1467_s30 = sld [smem:[#allocation3 + $0x1b]] }
  0x46   :  { %s1455_s4 = sld [smem:[#allocation3 + $0x28]] }
  0x47   :  { %s1447_s5 = sld [smem:[#allocation3 + $0x51]] }
  0x48   :  { %s1469_s7 = sld [smem:[#allocation3 + $0x29]] }
  0x49   :  { %s1473_s8 = sld [smem:[#allocation3 + $0x45]] }
  0x4a   :  { %s1461_s9 = sld [smem:[#allocation3 + $0x52]] }
  0x4b   :  { %s1421_s10 = sld [smem:[#allocation3 + $0x5d]] }
  0x4c   :  { %s1407_s12 = sld [smem:[#allocation3 + $0x5c]] }
  0x4d   :  { %s1449_s13 = sld [smem:[#allocation3 + $0x5f]] }
  0x4e   :  { %s1435_s14 = sld [smem:[#allocation3 + $0x5e]] }
  0x4f   :  { %s1475_s15 = sld [smem:[#allocation3 + $0x53]] }
  0x50   :  { %s1463_s16 = sld [smem:[#allocation3 + $0x60]] }
  0x51   :  { %s1396_s17 = sld [smem:[#allocation3 + $0xf]] }
  0x52   :  { %s1410_s19 = sld [smem:[#allocation3 + $0x10]] }
  0x53   :  { %s1424_s20 = sld [smem:[#allocation3 + $0x11]] }
  0x54   :  { %s1438_s21 = sld [smem:[#allocation3 + $0x12]] }
  0x55   :  { %s1452_s22 = sld [smem:[#allocation3 + $0x13]] }
  0x56   :  { %s1383_s24 = sld [smem:[#allocation3 + $0x15]] }
  0xa1   :  { %v98_v33 = vpop.permute.xlu0 %97 }
  0xa2   :  { %v99_v34 = vrot.slane %v98_v33, 6 }
  0xa4   :  { %v101_v35 = vsel %vm100_vm6, %v99_v34, %v98_v33 }
  0xa5   :  { %108 = vst.msk [vmem:[#allocation2] sm:$0x3f] %vm107_vm7, %v101_v35  ;;  %v120_v36 = vpop.permute.xlu0 %119  ;;  %v464_v35 = vstv %s1411_s25  ;;  %s1398_s25 = sld [smem:[#allocation3 + $0x1d]] }
  0xa6   :  { %v121_v37 = vrot.slane %v120_v36, 6 }
  0xa8   :  { %v122_v38 = vsel %vm100_vm6, %v121_v37, %v120_v36  ;;  %v962_v37 = vstv %s1453_s1  ;;  %s1412_s1 = sld [smem:[#allocation3 + $0x1e]] }
  0xa9   :  { %125 = vst.msk [vmem:[#allocation2 + $0x6] sm:$0x3f] %vm107_vm7, %v122_v38 }
  0xac   :  { %v1703_v28 = vld [vmem:[#allocation2] sm:$0x3f] }
  0xad   :  { %v1705_v30 = vld [vmem:[#allocation2] sm:$0x3f]  ;;  %v299_v32 = vmul.f32 %v298_v29, %v1703_v28  ;;  %v952_v29 = vstv %s1452_s22  ;;  %s1863_s22 = sld [smem:[#allocation3 + $0xd]] }
  0xae   :  { %v631_v33 = vmul.f32 %v630_v31, %v1705_v30  ;;  %v1711_v34 = vld [vmem:[#allocation2] sm:$0x3f] }
  0xaf   :  { %v1713_v36 = vld [vmem:[#allocation2] sm:$0x3f]  ;;  %v465_v38 = vmul.f32 %v464_v35, %v1711_v34  ;;  %v146_v35 = vstv %s1383_s24  ;;  %s1865_s24 = sld [smem:[#allocation3 + $0x3d]] }
  0xb0   :  { %v1647_v41 = vld [vmem:[#allocation2 + $0x6] sm:$0x3f] }
  0xb1   :  { %v1649_v42 = vld [vmem:[#allocation2 + $0x6] sm:$0x3f]  ;;  %v524_v43 = vmul.f32 %v523_v39, %v1647_v41  ;;  %v544_v59 = vmul.f32 %v543_v57, %v1647_v41  ;;  %v514_v14 = vmul.f32 %v513_v12, %v1647_v41  ;;  %v534_v27 = vmul.f32 %v533_v25, %v1647_v41 }
  0xb2   :  { %v358_v44 = vmul.f32 %v357_v40, %v1649_v42  ;;  %v1653_v45 = vld [vmem:[#allocation2 + $0x6] sm:$0x3f]  ;;  %v378_v54 = vmul.f32 %v377_v51, %v1649_v42  ;;  %v348_v9 = vmul.f32 %v347_v6, %v1649_v42  ;;  %v368_v22 = vmul.f32 %v367_v20, %v1649_v42  ;;  %v1719_v40 = vld [vmem:[#allocation2] sm:$0x3f] }
  0xb3   :  { %v1655_v47 = vld [vmem:[#allocation2 + $0x6] sm:$0x3f]  ;;  %526 = vrot.lane.b32.xlu1 %v524_v43, %s1598_s6  ;;  %v856_v49 = vmul.f32 %v855_v46, %v1653_v45  ;;  %v876_v63 = vmul.f32 %v875_v61, %v1653_v45  ;;  %v846_v19 = vmul.f32 %v845_v17, %v1653_v45  ;;  %v963_v39 = vmul.f32 %v962_v37, %v1713_v36 }
  0xb4   :  { %360 = vrot.lane.b32.xlu0 %v358_v44, %s1598_s6  ;;  %v690_v50 = vmul.f32 %v689_v48, %v1655_v47  ;;  %v1661_v52 = vld [vmem:[#allocation2 + $0x6] sm:$0x3f]  ;;  %v710_v58 = vmul.f32 %v709_v56, %v1655_v47  ;;  %v680_v13 = vmul.f32 %v679_v11, %v1655_v47  ;;  %v700_v26 = vmul.f32 %v699_v24, %v1655_v47 }
  0xb5   :  { %v1022_v55 = vmul.f32 %v1021_v53, %v1661_v52  ;;  %v1042_v62 = vmul.f32 %v1041_v60, %v1661_v52  ;;  %v1675_v0 = vld [vmem:[#allocation2 + $0x6] sm:$0x3f]  ;;  %v1012_v18 = vmul.f32 %v1011_v16, %v1661_v52  ;;  %v796_v43 = vstv %s1439_s2  ;;  %s1426_s2 = sld [smem:[#allocation3 + $0x1f]] }
  0xb6   :  { %v1208_v3 = vmul.f32 %v1207_v1, %v1675_v0  ;;  %v1188_v5 = vmul.f32 %v1187_v2, %v1675_v0  ;;  %v1681_v7 = vld [vmem:[#allocation2 + $0x6] sm:$0x3f]  ;;  %v484_v44 = vstv %s1413_s26  ;;  %v797_v46 = vmul.f32 %v796_v43, %v1719_v40  ;;  %s1440_s26 = sld [smem:[#allocation3 + $0x20]] }
  0xb7   :  { %858 = vrot.lane.b32.xlu1 %v856_v49, %s1598_s6  ;;  %v209_v10 = vmul.f32 %v208_v8, %v1681_v7  ;;  %v229_v23 = vmul.f32 %v228_v21, %v1681_v7  ;;  %v485_v48 = vmul.f32 %v484_v44, %v1711_v34  ;;  %v318_v49 = vstv %s1399_s27  ;;  %s1454_s27 = sld [smem:[#allocation3 + $0x21]] }
  0xb8   :  { %692 = vrot.lane.b32.xlu0 %v690_v50, %s1598_s6  ;;  %v816_v50 = vstv %s1441_s28  ;;  %v319_v51 = vmul.f32 %v318_v49, %v1703_v28  ;;  %v1128_v56 = vstv %s1467_s30  ;;  %v865_v60 = vstv %s1447_s5  ;;  %s1466_s28 = sld [smem:[#allocation3 + $0x14]] }
  0xb9   :  { %v817_v53 = vmul.f32 %v816_v50, %v1719_v40  ;;  %v1177_v1 = vstv %s1473_s8  ;;  %v553_v6 = vstv %s1421_s10  ;;  %v885_v11 = vstv %s1449_s13  ;;  %s1400_s30 = sld [smem:[#allocation3 + $0x2b]] }
  0xba   :  { %v1197_v16 = vstv %s1475_s15  ;;  %v288_v20 = vstv %s1396_s17  ;;  %v620_v24 = vstv %s1424_s20  ;;  %v308_v37 = vstv %s1398_s25  ;;  %s1428_s5 = sld [smem:[#allocation3 + $0x2d]] }
  0xbb   :  { %380 = vrot.lane.b32.xlu1 %v378_v54, %s1599_s11  ;;  %v650_v54 = vstv %s1427_s29  ;;  %v474_v43 = vstv %s1412_s1  ;;  %v640_v44 = vstv %s1426_s2  ;;  %s1385_s29 = sld [smem:[#allocation3 + $0x23]] }
  0xbc   :  { %1024 = vrot.lane.b32.xlu0 %v1022_v55, %s1598_s6  ;;  %v1729_v55 = vld [vmem:[#allocation2] sm:$0x3f]  ;;  %v651_v57 = vmul.f32 %v650_v54, %v1705_v30  ;;  %v806_v49 = vstv %s1440_s26  ;;  %s1456_s8 = sld [smem:[#allocation3 + $0x2f]]  ;;  %s1601_s26 = smov 112  }
  0xbd   :  { %v972_v50 = vstv %s1454_s27  ;;  %s1470_s10 = sld [smem:[#allocation3 + $0x30]] }
  0xbe   :  { %v1118_v54 = vstv %s1466_s28  ;;  %s1839_s13 = sld [smem:[#allocation3 + $0xa]] }
  0xbf   :  { %712 = vrot.lane.b32.xlu1 %v710_v58, %s1599_s11  ;;  %v1129_v58 = vmul.f32 %v1128_v56, %v1729_v55  ;;  %s1843_s15 = sld [smem:[#allocation3 + $0xc]] }
  0xc0   :  { %546 = vrot.lane.b32.xlu0 %v544_v59, %s1599_s11  ;;  %v982_v59 = vstv %s1455_s4  ;;  %s1414_s4 = sld [smem:[#allocation3 + $0x2c]] }
  0xc1   :  { %v983_v61 = vmul.f32 %v982_v59, %v1713_v36  ;;  %v167_v56 = vstv %s1385_s29  ;;  %v328_v59 = vstv %s1400_s30  ;;  %s1851_s17 = sld [smem:[#allocation3 + $0x3a]] }
  0xc2   :  { %s1855_s20 = sld [smem:[#allocation3 + $0x3c]] }
  0xc3   :  { %1044 = vrot.lane.b32.xlu1 %v1042_v62, %s1599_s11  ;;  %v866_v62 = vmul.f32 %v865_v60, %v1653_v45  ;;  %s1867_s25 = sld [smem:[#allocation3 + $0x61]] }
  0xc4   :  { %878 = vrot.lane.b32.xlu0 %v876_v63, %s1599_s11  ;;  %v1148_v63 = vstv %s1469_s7  ;;  %s1442_s7 = sld [smem:[#allocation3 + $0x2e]] }
  0xc5   :  { %v1149_v2 = vmul.f32 %v1148_v63, %v1729_v55  ;;  %v660_v63 = vstv %s1428_s5  ;;  %s1913_s1 = sld [smem:[#allocation3 + $0x3e]] }
  0xc6   :  { %v494_v60 = vstv %s1414_s4  ;;  %s1920_s2 = sld [smem:[#allocation3 + $0xe]] }
  0xc7   :  { %1210 = vrot.lane.b32.xlu1 %v1208_v3, %s1599_s11  ;;  %v1178_v3 = vmul.f32 %v1177_v1, %v1675_v0  ;;  %s1938_s27 = sld [smem:[#allocation3 + $0x2a]] }
  0xc8   :  { %1190 = vrot.lane.b32.xlu0 %v1188_v5, %s1598_s6  ;;  %v1031_v5 = vstv %s1461_s9  ;;  %s1468_s9 = sld [smem:[#allocation3 + $0x22]] }
  0xc9   :  { %v1032_v8 = vmul.f32 %v1031_v5, %v1661_v52  ;;  %v661_v5 = vmul.f32 %v660_v63, %v1705_v30  ;;  %s1954_s28 = sld [smem:[#allocation3 + $0x4d]] }
  0xca   :  { %v826_v1 = vstv %s1442_s7  ;;  %s1961_s29 = sld [smem:[#allocation3 + $0x1c]] }
  0xcb   :  { %350 = vrot.lane.b32.xlu1 %v348_v9, %s1598_s6  ;;  %v554_v9 = vmul.f32 %v553_v6, %v1647_v41  ;;  %v827_v6 = vmul.f32 %v826_v1, %v1719_v40  ;;  %s1974_s30 = sld [smem:[#allocation3 + $0x1]] }
  0xcc   :  { %211 = vrot.lane.b32.xlu0 %v209_v10, %s1598_s6  ;;  %v387_v10 = vstv %s1407_s12  ;;  %s1837_s12 = sld [smem:[#allocation3 + $0x8]] }
  0xcd   :  { %v388_v12 = vmul.f32 %v387_v10, %v1649_v42  ;;  %s1389_s4 = sld [smem:[#allocation3 + $0x3f]] }
  0xce   :  { %s1987_s5 = sld [smem:[#allocation3 + $0x2]] }
  0xcf   :  { %682 = vrot.lane.b32.xlu1 %v680_v13, %s1598_s6  ;;  %v886_v13 = vmul.f32 %v885_v11, %v1653_v45  ;;  %s1990_s7 = sld [smem:[#allocation3 + $0x3]] }
  0xd0   :  { %516 = vrot.lane.b32.xlu0 %v514_v14, %s1598_s6  ;;  %v719_v14 = vstv %s1435_s14  ;;  %s1841_s14 = sld [smem:[#allocation3 + $0x9]] }
  0xd1   :  { %v720_v17 = vmul.f32 %v719_v14, %v1655_v47  ;;  %v1158_v14 = vstv %s1470_s10  ;;  %s2007_s10 = sld [smem:[#allocation3 + $0x5]] }
  0xd3   :  { %1014 = vrot.lane.b32.xlu1 %v1012_v18, %s1598_s6  ;;  %v1198_v18 = vmul.f32 %v1197_v16, %v1675_v0 }
  0xd4   :  { %848 = vrot.lane.b32.xlu0 %v846_v19, %s1598_s6  ;;  %v1051_v19 = vstv %s1463_s16  ;;  %s1849_s16 = sld [smem:[#allocation3 + $0xb]] }
  0xd5   :  { %v1052_v21 = vmul.f32 %v1051_v19, %v1661_v52 }
  0xd7   :  { %370 = vrot.lane.b32.xlu1 %v368_v22, %s1599_s11  ;;  %v289_v22 = vmul.f32 %v288_v20, %v1703_v28 }
  0xd8   :  { %231 = vrot.lane.b32.xlu0 %v229_v23, %s1599_s11  ;;  %v454_v23 = vstv %s1410_s19  ;;  %s1853_s19 = sld [smem:[#allocation3 + $0x39]] }
  0xd9   :  { %v455_v25 = vmul.f32 %v454_v23, %v1711_v34 }
  0xdb   :  { %702 = vrot.lane.b32.xlu1 %v700_v26, %s1599_s11  ;;  %v621_v26 = vmul.f32 %v620_v24, %v1705_v30 }
  0xdc   :  { %536 = vrot.lane.b32.xlu0 %v534_v27, %s1599_s11  ;;  %v786_v27 = vstv %s1438_s21  ;;  %s1861_s21 = sld [smem:[#allocation3 + $0x3b]] }
  0xdd   :  { %v787_v31 = vmul.f32 %v786_v27, %v1719_v40 }
  0xdf   :  { %301 = vrot.lane.b32.xlu1 %v299_v32, %s1598_s6  ;;  %v953_v32 = vmul.f32 %v952_v29, %v1713_v36 }
  0xe0   :  { %633 = vrot.lane.b32.xlu0 %v631_v33, %s1598_s6  ;;  %v1767_v33 = vld [vmem:[#allocation2] sm:$0x3f] }
  0xe3   :  { %467 = vrot.lane.b32.xlu1 %v465_v38, %s1598_s6  ;;  %v147_v38 = vmul.f32 %v146_v35, %v1767_v33 }
  0xe4   :  { %965 = vrot.lane.b32.xlu0 %v963_v39, %s1598_s6  ;;  %v309_v39 = vmul.f32 %v308_v37, %v1703_v28 }
  0xe7   :  { %799 = vrot.lane.b32.xlu1 %v797_v46, %s1598_s6  ;;  %v475_v46 = vmul.f32 %v474_v43, %v1711_v34 }
  0xe8   :  { %487 = vrot.lane.b32.xlu0 %v485_v48, %s1599_s11  ;;  %v641_v48 = vmul.f32 %v640_v44, %v1705_v30 }
  0xeb   :  { %321 = vrot.lane.b32.xlu1 %v319_v51, %s1599_s11  ;;  %v807_v51 = vmul.f32 %v806_v49, %v1719_v40  ;;  %v451_v49 = vstv %s1841_s14  ;;  %s2026_s14 = sld [smem:[#allocation3 + $0x32]] }
  0xec   :  { %819 = vrot.lane.b32.xlu0 %v817_v53, %s1599_s11  ;;  %v973_v53 = vmul.f32 %v972_v50, %v1713_v36 }
  0xef   :  { %653 = vrot.lane.b32.xlu1 %v651_v57, %s1599_s11  ;;  %v1119_v57 = vmul.f32 %v1118_v54, %v1729_v55  ;;  %v783_v54 = vstv %s1849_s16  ;;  %s2042_s16 = sld [smem:[#allocation3 + $0x35]] }
  0xf0   :  { %1131 = vrot.lane.b32.xlu0 %v1129_v58, %s1598_s6  ;;  %v168_v58 = vmul.f32 %v167_v56, %v1767_v33 }
  0xf3   :  { %985 = vrot.lane.b32.xlu1 %v983_v61, %s1599_s11  ;;  %v329_v61 = vmul.f32 %v328_v59, %v1703_v28  ;;  %v841_v59 = vstv %s1855_s20  ;;  %s1604_s20 = smov 127  }
  0xf4   :  { %868 = vrot.lane.b32.xlu0 %v866_v62, %s1599_s11  ;;  %v495_v62 = vmul.f32 %v494_v60, %v1711_v34  ;;  %v675_v60 = vstv %s1861_s21  ;;  %s1605_s21 = smov 124  }
  0xf7   :  { %1151 = vrot.lane.b32.xlu1 %v1149_v2, %s1599_s11 }
  0xf8   :  { %1180 = vrot.lane.b32.xlu0 %v1178_v3, %s1598_s6 }
  0xfb   :  { %1034 = vrot.lane.b32.xlu1 %v1032_v8, %s1599_s11  ;;  %v992_v8 = vstv %s1456_s8  ;;  %s1994_s8 = sld [smem:[#allocation3 + $0x5b]] }
  0xfc   :  { %556 = vrot.lane.b32.xlu0 %v554_v9, %s1600_s18  ;;  %v1138_v9 = vstv %s1468_s9  ;;  %s2004_s9 = sld [smem:[#allocation3 + $0x4]] }
  0xff   :  { %390 = vrot.lane.b32.xlu1 %v388_v12, %s1600_s18  ;;  %v993_v12 = vmul.f32 %v992_v8, %v1713_v36 }
 0x100   :  { %888 = vrot.lane.b32.xlu0 %v886_v13, %s1600_s18  ;;  %v1139_v13 = vmul.f32 %v1138_v9, %v1729_v55 }
 0x103   :  { %722 = vrot.lane.b32.xlu1 %v720_v17, %s1600_s18 }
 0x104   :  { %1200 = vrot.lane.b32.xlu0 %v1198_v18, %s1599_s11  ;;  %v1159_v18 = vmul.f32 %v1158_v14, %v1729_v55 }
 0x107   :  { %1054 = vrot.lane.b32.xlu1 %v1052_v21, %s1600_s18 }
 0x108   :  { %291 = vrot.lane.b32.xlu0 %v289_v22, %s1598_s6 }
 0x10b   :  { %457 = vrot.lane.b32.xlu1 %v455_v25, %s1598_s6 }
 0x10c   :  { %623 = vrot.lane.b32.xlu0 %v621_v26, %s1598_s6 }
 0x10f   :  { %789 = vrot.lane.b32.xlu1 %v787_v31, %s1598_s6 }
 0x110   :  { %955 = vrot.lane.b32.xlu0 %v953_v32, %s1598_s6 }
 0x113   :  { %149 = vrot.lane.b32.xlu1 %v147_v38, %s1598_s6 }
 0x114   :  { %311 = vrot.lane.b32.xlu0 %v309_v39, %s1599_s11 }
 0x117   :  { %477 = vrot.lane.b32.xlu1 %v475_v46, %s1599_s11  ;;  %v285_v46 = vstv %s1837_s12  ;;  %s2015_s12 = sld [smem:[#allocation3 + $0x7]] }
 0x118   :  { %643 = vrot.lane.b32.xlu0 %v641_v48, %s1599_s11  ;;  %v617_v48 = vstv %s1839_s13  ;;  %v286_v8 = vmul.f32 %v285_v46, %v1703_v28  ;;  %s2021_s13 = sld [smem:[#allocation3 + $0x6]] }
 0x119   :  { %v618_v9 = vmul.f32 %v617_v48, %v1705_v30 }
 0x11b   :  { %809 = vrot.lane.b32.xlu1 %v807_v51, %s1599_s11  ;;  %v949_v51 = vstv %s1843_s15  ;;  %s2031_s15 = sld [smem:[#allocation3 + $0x33]] }
 0x11c   :  { %975 = vrot.lane.b32.xlu0 %v973_v53, %s1599_s11  ;;  %v950_v4 = vmul.f32 %v949_v51, %v1713_v36 }
 0x11f   :  { %1121 = vrot.lane.b32.xlu1 %v1119_v57, %s1598_s6  ;;  %v509_v57 = vstv %s1851_s17  ;;  %s2044_s17 = sld [smem:[#allocation3 + $0x36]] }
 0x120   :  { %170 = vrot.lane.b32.xlu0 %v168_v58, %s1599_s11  ;;  %v343_v58 = vstv %s1853_s19  ;;  %s2048_s19 = sld [smem:[#allocation3 + $0x37]] }
 0x123   :  { %331 = vrot.lane.b32.xlu1 %v329_v61, %s1600_s18 }
 0x124   :  { %497 = vrot.lane.b32.xlu0 %v495_v62, %s1600_s18 }
 0x125   :  { %v1791_v2 = vpop.permute.xlu1 %526 }
 0x126   :  { %v1793_v3 = vpop.permute.xlu0 %360 }
 0x127   :  { %663 = vrot.lane.b32.xlu1 %v661_v5, %s1600_s18  ;;  %v344_v5 = vmul.f32 %v343_v58, %v1649_v42 }
 0x128   :  { %829 = vrot.lane.b32.xlu0 %v827_v6, %s1600_s18  ;;  %v528_v6 = vrot.slane %v1791_v2, 2 }
 0x129   :  { %v1799_v10 = vpop.permute.xlu1 %858 }
 0x12a   :  { %v1801_v11 = vpop.permute.xlu0 %692  ;;  %v860_v58 = vrot.slane %v1799_v10, 2 }
 0x12b   :  { %995 = vrot.lane.b32.xlu1 %v993_v12, %s1600_s18  ;;  %v452_v12 = vmul.f32 %v451_v49, %v1711_v34 }
 0x12c   :  { %1141 = vrot.lane.b32.xlu0 %v1139_v13, %s1599_s11 }
 0x12d   :  { %v1807_v16 = vpop.permute.xlu1 %380 }
 0x12e   :  { %v1809_v17 = vpop.permute.xlu0 %1024 }
 0x12f   :  { %1161 = vrot.lane.b32.xlu1 %v1159_v18, %s1600_s18  ;;  %v362_v18 = vrot.slane %v1793_v3, 2 }
 0x131   :  { %v1813_v19 = vpop.permute.xlu1 %712 }
 0x132   :  { %v1815_v20 = vpop.permute.xlu0 %546 }
 0x133   :  { %v548_v42 = vrot.slane %v1815_v20, 2 }
 0x135   :  { %v1817_v21 = vpop.permute.xlu1 %1044 }
 0x136   :  { %v1819_v22 = vpop.permute.xlu0 %878 }
 0x139   :  { %v1821_v23 = vpop.permute.xlu1 %1210 }
 0x13a   :  { %v1823_v24 = vpop.permute.xlu0 %1190 }
 0x13d   :  { %v1825_v25 = vpop.permute.xlu1 %350 }
 0x13e   :  { %v1827_v26 = vpop.permute.xlu0 %211 }
 0x141   :  { %v1829_v27 = vpop.permute.xlu1 %682 }
 0x142   :  { %v1831_v29 = vpop.permute.xlu0 %516 }
 0x145   :  { %v1833_v31 = vpop.permute.xlu1 %1014 }
 0x146   :  { %v1835_v32 = vpop.permute.xlu0 %848 }
 0x149   :  { %v1845_v35 = vpop.permute.xlu1 %370 }
 0x14a   :  { %v1847_v37 = vpop.permute.xlu0 %231 }
 0x14b   :  { %2289 = vst [vmem:[#allocation16_spill] sm:$0xff] %v1847_v37 }
 0x14d   :  { %v1857_v38 = vpop.permute.xlu1 %702 }
 0x14e   :  { %2290 = vst [vmem:[#allocation17_spill] sm:$0xff] %v1857_v38  ;;  %v1859_v39 = vpop.permute.xlu0 %536  ;;  %v529_v38 = vsel %vm141_vm8, %v1791_v2, %v528_v6 }
 0x14f   :  { %2291 = vst [vmem:[#allocation18_spill] sm:$0xff] %v1859_v39 }
 0x151   :  { %v302_v43 = vpop.permute.xlu1 %301 }
 0x152   :  { %v634_v44 = vpop.permute.xlu0 %633  ;;  %v303_v63 = vrot.slane %v302_v43, 2 }
 0x153   :  { %v635_v48 = vrot.slane %v634_v44, 2 }
 0x154   :  { %v304_v46 = vsel %vm141_vm8, %v302_v43, %v303_v63 }
 0x155   :  { %v468_v50 = vpop.permute.xlu1 %467 }
 0x156   :  { %v1873_v53 = vpop.permute.xlu0 %965  ;;  %v469_v56 = vrot.slane %v468_v50, 2 }
 0x157   :  { %v967_v2 = vrot.slane %v1873_v53, 2 }
 0x158   :  { %v470_v1 = vsel %vm141_vm8, %v468_v50, %v469_v56  ;;  %v784_v50 = vmul.f32 %v783_v54, %v1719_v40  ;;  %v510_v56 = vmul.f32 %v509_v57, %v1647_v41  ;;  %v676_v54 = vmul.f32 %v675_v60, %v1655_v47 }
 0x159   :  { %v800_v13 = vpop.permute.xlu1 %799  ;;  %v472_v15 = vadd.f32 %v470_v1, %v452_v12  ;;  %v842_v1 = vmul.f32 %v841_v59, %v1653_v45  ;;  %v363_v41 = vsel %vm141_vm8, %v1793_v3, %v362_v18 }
 0x15a   :  { %v488_v14 = vpop.permute.xlu0 %487  ;;  %v801_v62 = vrot.slane %v800_v13, 2 }
 0x15b   :  { %v489_v61 = vrot.slane %v488_v14, 2 }
 0x15c   :  { %v802_v49 = vsel %vm141_vm8, %v800_v13, %v801_v62 }
 0x15d   :  { %v490_v39 = vsel %vm162_vm9, %v488_v14, %v489_v61  ;;  %v322_v37 = vpop.permute.xlu1 %321  ;;  %v306_v61 = vadd.f32 %v304_v46, %v286_v8  ;;  %v804_v62 = vadd.f32 %v802_v49, %v784_v50  ;;  %v382_v8 = vrot.slane %v1807_v16, 2 }
 0x15e   :  { %v492_v51 = vadd.f32 %v490_v39, %v472_v15  ;;  %v820_v12 = vpop.permute.xlu0 %819  ;;  %v323_v43 = vrot.slane %v322_v37, 2  ;;  %v636_v15 = vsel %vm141_vm8, %v634_v44, %v635_v48  ;;  %v694_v39 = vrot.slane %v1801_v11, 2 }
 0x15f   :  { %v821_v57 = vrot.slane %v820_v12, 2  ;;  %v549_v14 = vsel %vm162_vm9, %v1815_v20, %v548_v42  ;;  %v880_v44 = vrot.slane %v1819_v22, 2  ;;  %v861_v48 = vsel %vm141_vm8, %v1799_v10, %v860_v58 }
 0x160   :  { %v511_v63 = vadd.f32 %v510_v56, %v492_v51  ;;  %v324_v45 = vsel %vm162_vm9, %v322_v37, %v323_v43  ;;  %v638_v37 = vadd.f32 %v636_v15, %v618_v9 }
 0x161   :  { %v822_v47 = vsel %vm162_vm9, %v820_v12, %v821_v57  ;;  %v326_v3 = vadd.f32 %v324_v45, %v306_v61  ;;  %v654_v60 = vpop.permute.xlu1 %653  ;;  %v2292_v12 = vstv %s1863_s22  ;;  %v881_v57 = vsel %vm162_vm9, %v1819_v22, %v880_v44  ;;  %s1606_s22 = smov 125  }
 0x162   :  { %v824_v59 = vadd.f32 %v822_v47, %v804_v62  ;;  %v1132_v6 = vpop.permute.xlu0 %1131  ;;  %v531_v13 = vadd.f32 %v529_v38, %v511_v63  ;;  %v655_v18 = vrot.slane %v654_v60, 2  ;;  %v968_v38 = vsel %vm141_vm8, %v1873_v53, %v967_v2 }
 0x163   :  { %v345_v50 = vadd.f32 %v344_v5, %v326_v3  ;;  %v1133_v51 = vrot.slane %v1132_v6, 2  ;;  %v1116_v42 = vmul.f32 %v2292_v12, %v1729_v55  ;;  %v383_v53 = vsel %vm162_vm9, %v1807_v16, %v382_v8 }
 0x164   :  { %v843_v56 = vadd.f32 %v842_v1, %v824_v59  ;;  %v551_v46 = vadd.f32 %v549_v14, %v531_v13  ;;  %v656_v49 = vsel %vm162_vm9, %v654_v60, %v655_v18  ;;  %v714_v1 = vrot.slane %v1813_v19, 2 }
 0x165   :  { %v658_v20 = vadd.f32 %v656_v49, %v638_v37  ;;  %v986_v43 = vpop.permute.xlu1 %985  ;;  %v365_v10 = vadd.f32 %v363_v41, %v345_v50  ;;  %v970_v61 = vadd.f32 %v968_v38, %v950_v4  ;;  %v695_v2 = vsel %vm141_vm8, %v1801_v11, %v694_v39 }
 0x166   :  { %565 = vrot.lane.b32.xlu0 %v551_v46, %s1601_s26  ;;  %v1926_v5 = vpop.permute.xlu0 %868  ;;  %v863_v9 = vadd.f32 %v861_v48, %v843_v56  ;;  %v987_v58 = vrot.slane %v986_v43, 2  ;;  %v1026_v41 = vrot.slane %v1809_v17, 2  ;;  %v1134_v45 = vsel %vm141_vm8, %v1132_v6, %v1133_v51 }
 0x167   :  { %v677_v62 = vadd.f32 %v676_v54, %v658_v20  ;;  %v385_v63 = vadd.f32 %v383_v53, %v365_v10  ;;  %v2293_v22 = vstv %s1865_s24  ;;  %v715_v3 = vsel %vm162_vm9, %v1813_v19, %v714_v1  ;;  %s1607_s24 = smov 123  }
 0x168   :  { %v883_v15 = vadd.f32 %v881_v57, %v863_v9  ;;  %v988_v16 = vsel %vm162_vm9, %v986_v43, %v987_v58  ;;  %v1008_v47 = vmul.f32 %v2293_v22, %v1661_v52  ;;  %v1046_v59 = vrot.slane %v1817_v21, 2 }
 0x169   :  { %v990_v4 = vadd.f32 %v988_v16, %v970_v61  ;;  %v1152_v54 = vpop.permute.xlu1 %1151  ;;  %399 = vrot.lane.b32.xlu1 %v385_v63, %s1601_s26  ;;  %v697_v39 = vadd.f32 %v695_v2, %v677_v62  ;;  %v1173_v60 = vstv %s1913_s1  ;;  %v1136_v13 = vadd.f32 %v1134_v45, %v1116_v42  ;;  %s1608_s1 = smov 122  }
 0x16a   :  { %897 = vrot.lane.b32.xlu0 %v883_v15, %s1601_s26  ;;  %v1945_v11 = vpop.permute.xlu0 %1180  ;;  %v1153_v6 = vrot.slane %v1152_v54, 2  ;;  %v2294_v14 = vstv %s1867_s25  ;;  %v1027_v18 = vsel %vm141_vm8, %v1809_v17, %v1026_v41  ;;  %v1192_v37 = vrot.slane %v1823_v24, 2  ;;  %s126_s25 = sld [smem:[#allocation3]] }
 0x16b   :  { %v1009_v8 = vadd.f32 %v1008_v47, %v990_v4  ;;  %v717_v52 = vadd.f32 %v715_v3, %v697_v39  ;;  %v1218_v44 = vmul.f32 %v2294_v14, %v1675_v0  ;;  %v135_v19 = vstv %s1920_s2  ;;  %s1387_s2 = sld [smem:[#allocation3 + $0x31]] }
 0x16c   :  { %v1154_v50 = vsel %vm162_vm9, %v1152_v54, %v1153_v6  ;;  %v1174_v56 = vmul.f32 %v1173_v60, %v1675_v0  ;;  %v1047_v49 = vsel %vm162_vm9, %v1817_v21, %v1046_v59  ;;  %v1212_v51 = vrot.slane %v1821_v23, 2 }
 0x16d   :  { %v1156_v46 = vadd.f32 %v1154_v50, %v1136_v13  ;;  %v1964_v48 = vpop.permute.xlu1 %1034  ;;  %731 = vrot.lane.b32.xlu1 %v717_v52, %s1601_s26  ;;  %v1029_v17 = vadd.f32 %v1027_v18, %v1009_v8  ;;  %v136_v42 = vmul.f32 %v135_v19, %v1767_v33  ;;  %v1193_v43 = vsel %vm141_vm8, %v1823_v24, %v1192_v37 }
 0x16e   :  { %1220 = vrot.lane.b32.xlu0 %v1218_v44, %s1600_s18  ;;  %v1968_v38 = vpop.permute.xlu0 %556  ;;  %v177_v10 = vstv %s1938_s27  ;;  %v1213_v1 = vsel %vm162_vm9, %v1821_v23, %v1212_v51  ;;  %v218_v58 = vstv %s1954_s28  ;;  %v156_v61 = vstv %s1961_s29 }
 0x16f   :  { %v1175_v20 = vadd.f32 %v1174_v56, %v1156_v46  ;;  %v1049_v12 = vadd.f32 %v1047_v49, %v1029_v17  ;;  %v178_v57 = vmul.f32 %v177_v10, %v1767_v33  ;;  %v219_v23 = vmul.f32 %v218_v58, %v1681_v7 }
 0x170   :  { %v157_v15 = vmul.f32 %v156_v61, %v1767_v33  ;;  %v282_v2 = vstv %s1974_s30  ;;  %v198_v41 = vstv %s1389_s4  ;;  %v448_v39 = vstv %s1987_s5 }
 0x171   :  { %v1979_v9 = vpop.permute.xlu1 %390  ;;  %1063 = vrot.lane.b32.xlu1 %v1049_v12, %s1601_s26  ;;  %v1195_v53 = vadd.f32 %v1193_v43, %v1175_v20  ;;  %v283_v47 = vmul.f32 %v282_v2, %v1703_v28  ;;  %v199_v4 = vmul.f32 %v198_v41, %v1681_v7  ;;  %v614_v3 = vstv %s1990_s7 }
 0x172   :  { %138 = vrot.lane.b32.xlu0 %v136_v42, %s1598_s6  ;;  %v1983_v21 = vpop.permute.xlu0 %888  ;;  %v238_v59 = vstv %s1994_s8  ;;  %v449_v52 = vmul.f32 %v448_v39, %v1711_v34  ;;  %v615_v14 = vmul.f32 %v614_v3, %v1705_v30  ;;  %v780_v50 = vstv %s2004_s9 }
 0x173   :  { %v1215_v24 = vadd.f32 %v1213_v1, %v1195_v53  ;;  %v239_v44 = vmul.f32 %v238_v59, %v1681_v7  ;;  %v946_v19 = vstv %s2007_s10  ;;  %v781_v51 = vmul.f32 %v780_v50, %v1719_v40 }
 0x174   :  { %v947_v20 = vmul.f32 %v946_v19, %v1713_v36  ;;  %v339_v41 = vstv %s2026_s14  ;;  %v1169_v39 = vstv %s2048_s19  ;;  %v1511_v19 = vld [vmem:[#allocation2 + $0x6] sm:$0x3f] }
 0x175   :  { %v1996_v62 = vpop.permute.xlu1 %722  ;;  %1229 = vrot.lane.b32.xlu1 %v1215_v24, %s1601_s26 }
 0x176   :  { %180 = vrot.lane.b32.xlu0 %v178_v57, %s1600_s18  ;;  %v2000_v63 = vpop.permute.xlu0 %1200  ;;  %v132_v57 = vstv %s2015_s12 }
 0x179   :  { %v2009_v45 = vpop.permute.xlu1 %1054  ;;  %159 = vrot.lane.b32.xlu1 %v157_v15, %s1599_s11 }
 0x17a   :  { %221 = vrot.lane.b32.xlu0 %v219_v23, %s1599_s11  ;;  %v292_v16 = vpop.permute.xlu0 %291  ;;  %s2024_s11 = sld [smem:[#allocation3 + $0x38]]  ;;  %v1112_v23 = vstv %s2021_s13 }
 0x17b   :  { %v293_v22 = vrot.slane %v292_v16, 2 }
 0x17d   :  { %v294_v54 = vsel %vm141_vm8, %v292_v16, %v293_v22  ;;  %v458_v6 = vpop.permute.xlu1 %457  ;;  %201 = vrot.lane.b32.xlu1 %v199_v4, %s1598_s6  ;;  %s2037_s6 = sld [smem:[#allocation3 + $0x34]]  ;;  %v505_v16 = vstv %s2031_s15  ;;  %v837_v4 = vstv %s2042_s16 }
 0x17e   :  { %v296_v60 = vadd.f32 %v294_v54, %v283_v47  ;;  %v624_v13 = vpop.permute.xlu0 %623  ;;  %v459_v28 = vrot.slane %v458_v6, 2  ;;  %v133_v47 = vmul.f32 %v132_v57, %v1767_v33  ;;  %v1003_v54 = vstv %s2044_s17  ;;  %v1510_v33 = vld [vmem:[#allocation2 + $0x6] sm:$0x3f] }
 0x17f   :  { %v625_v8 = vrot.slane %v624_v13, 2  ;;  %v850_v57 = vrot.slane %v1835_v32, 2 }
 0x180   :  { %v460_v18 = vsel %vm141_vm8, %v458_v6, %v459_v28  ;;  %v194_v15 = vstv %s2024_s11  ;;  %v2069_v6 = vmul.f32 %v1112_v23, %v1729_v55 }
 0x181   :  { %v626_v37 = vsel %vm141_vm8, %v624_v13, %v625_v8  ;;  %v2039_v56 = vadd.f32 %v460_v18, %v449_v52  ;;  %v790_v17 = vpop.permute.xlu1 %789  ;;  %241 = vrot.lane.b32.xlu1 %v239_v44, %s1600_s18  ;;  %v352_v13 = vrot.slane %v1825_v25, 2  ;;  %v2077_v18 = vmul.f32 %v1510_v33, %v505_v16  ;;  %s1603_s18 = smov 126  }
 0x182   :  { %v628_v46 = vadd.f32 %v626_v37, %v615_v14  ;;  %v956_v49 = vpop.permute.xlu0 %955  ;;  %v791_v30 = vrot.slane %v790_v17, 2  ;;  %v1509_v14 = vld [vmem:[#allocation2 + $0x6] sm:$0x3f]  ;;  %v213_v37 = vrot.slane %v1827_v26, 2 }
 0x183   :  { %v957_v34 = vrot.slane %v956_v49, 2  ;;  %v671_v22 = vstv %s2037_s6  ;;  %v2075_v44 = vmul.f32 %v1509_v14, %v339_v41 }
 0x184   :  { %v792_v12 = vsel %vm141_vm8, %v790_v17, %v791_v30  ;;  %v2080_v55 = vmul.f32 %v1511_v19, %v671_v22  ;;  %v1512_v17 = vld [vmem:[#allocation2 + $0x6] sm:$0x3f] }
 0x185   :  { %v958_v42 = vsel %vm141_vm8, %v956_v49, %v957_v34  ;;  %v2052_v43 = vadd.f32 %v792_v12, %v781_v51  ;;  %v150_v53 = vpop.permute.xlu1 %149  ;;  %v1513_v49 = vld [vmem:[#allocation2 + $0x6] sm:$0x3f]  ;;  %v2088_v34 = vmul.f32 %v1169_v39, %v1675_v0  ;;  %v518_v51 = vrot.slane %v1831_v29, 2 }
 0x186   :  { %v960_v10 = vadd.f32 %v958_v42, %v947_v20  ;;  %v312_v1 = vpop.permute.xlu0 %311  ;;  %v151_v3 = vrot.slane %v150_v53, 2  ;;  %v2085_v30 = vmul.f32 %v1513_v49, %v1003_v54  ;;  %v214_v0 = vsel %vm141_vm8, %v1827_v26, %v213_v37 }
 0x187   :  { %v313_v40 = vrot.slane %v312_v1, 2  ;;  %v519_v39 = vsel %vm141_vm8, %v1831_v29, %v518_v51 }
 0x188   :  { %v152_v20 = vsel %vm141_vm8, %v150_v53, %v151_v3  ;;  %v2295_v53 = vld [vmem:[#allocation16_spill] sm:$0xff] }
 0x189   :  { %v314_v36 = vsel %vm162_vm9, %v312_v1, %v313_v40  ;;  %v478_v58 = vpop.permute.xlu1 %477  ;;  %v353_v1 = vsel %vm141_vm8, %v1825_v25, %v352_v13  ;;  %v1016_v40 = vrot.slane %v1833_v31, 2  ;;  %v2296_v25 = vld [vmem:[#allocation17_spill] sm:$0xff] }
 0x18a   :  { %v2056_v24 = vadd.f32 %v314_v36, %v296_v60  ;;  %v644_v61 = vpop.permute.xlu0 %643  ;;  %v195_v60 = vmul.f32 %v194_v15, %v1681_v7  ;;  %v2082_v7 = vmul.f32 %v1512_v17, %v837_v4  ;;  %v479_v12 = vrot.slane %v478_v58, 2  ;;  %v2297_v4 = vld [vmem:[#allocation18_spill] sm:$0xff] }
 0x18b   :  { %v645_v2 = vrot.slane %v644_v61, 2  ;;  %v372_v15 = vrot.slane %v1845_v35, 2  ;;  %v704_v22 = vrot.slane %v2296_v25, 2  ;;  %v538_v54 = vrot.slane %v2297_v4, 2 }
 0x18c   :  { %v480_v3 = vsel %vm162_vm9, %v478_v58, %v479_v12  ;;  %v2115_v13 = vsel %vm141_vm8, %v1833_v31, %v1016_v40 }
 0x18d   :  { %v646_v59 = vsel %vm162_vm9, %v644_v61, %v645_v2  ;;  %v810_v8 = vpop.permute.xlu1 %809  ;;  %v233_v2 = vrot.slane %v2295_v53, 2  ;;  %v373_v29 = vsel %vm162_vm9, %v1845_v35, %v372_v15  ;;  %v705_v31 = vsel %vm162_vm9, %v2296_v25, %v704_v22 }
 0x18e   :  { %v2073_v28 = vadd.f32 %v646_v59, %v628_v46  ;;  %v976_v52 = vpop.permute.xlu0 %975  ;;  %v684_v46 = vrot.slane %v1829_v27, 2  ;;  %v811_v26 = vrot.slane %v810_v8, 2  ;;  %v539_v19 = vsel %vm162_vm9, %v2297_v4, %v538_v54 }
 0x18f   :  { %v977_v50 = vrot.slane %v976_v52, 2  ;;  %v234_v58 = vsel %vm162_vm9, %v2295_v53, %v233_v2 }
 0x190   :  { %v2105_v16 = vsel %vm141_vm8, %v1829_v27, %v684_v46  ;;  %v851_v27 = vsel %vm141_vm8, %v1835_v32, %v850_v57  ;;  %v482_v32 = vadd.f32 %v480_v3, %v2039_v56  ;;  %v558_v46 = vrot.slane %v1968_v38, 2 }
 0x191   :  { %v978_v42 = vsel %vm162_vm9, %v976_v52, %v977_v50  ;;  %v1122_v61 = vpop.permute.xlu1 %1121  ;;  %v870_v52 = vrot.slane %v1926_v5, 2  ;;  %v812_v49 = vsel %vm162_vm9, %v810_v8, %v811_v26  ;;  %v1182_v56 = vrot.slane %v1945_v11, 2 }
 0x192   :  { %v2097_v36 = vadd.f32 %v978_v42, %v960_v10  ;;  %v171_v23 = vpop.permute.xlu0 %170  ;;  %v154_v10 = vadd.f32 %v152_v20, %v133_v47  ;;  %v814_v8 = vadd.f32 %v812_v49, %v2052_v43 }
 0x193   :  { %v172_v41 = vrot.slane %v171_v23, 2  ;;  %v871_v20 = vsel %vm162_vm9, %v1926_v5, %v870_v52  ;;  %v559_v5 = vsel %vm183_vm10, %v1968_v38, %v558_v46 }
 0x195   :  { %v173_v59 = vsel %vm162_vm9, %v171_v23, %v172_v41  ;;  %v332_v33 = vpop.permute.xlu1 %331 }
 0x196   :  { %v175_v14 = vadd.f32 %v173_v59, %v154_v10  ;;  %v498_v47 = vpop.permute.xlu0 %497  ;;  %v333_v37 = vrot.slane %v332_v33, 2 }
 0x197   :  { %v499_v50 = vrot.slane %v498_v47, 2 }
 0x198   :  { %v196_v17 = vadd.f32 %v195_v60, %v175_v14  ;;  %v334_v35 = vsel %vm183_vm10, %v332_v33, %v333_v37  ;;  %v1123_v60 = vrot.slane %v1122_v61, 2 }
 0x199   :  { %v500_v51 = vsel %vm183_vm10, %v498_v47, %v499_v50  ;;  %v336_v12 = vadd.f32 %v334_v35, %v2056_v24  ;;  %v664_v40 = vpop.permute.xlu1 %663  ;;  %v392_v24 = vrot.slane %v1979_v9, 2 }
 0x19a   :  { %v502_v42 = vadd.f32 %v500_v51, %v482_v32  ;;  %v830_v57 = vpop.permute.xlu0 %829  ;;  %v216_v23 = vadd.f32 %v214_v0, %v196_v17  ;;  %v665_v15 = vrot.slane %v664_v40, 2 }
 0x19b   :  { %v831_v53 = vrot.slane %v830_v57, 2  ;;  %v341_v2 = vadd.f32 %v2075_v44, %v336_v12  ;;  %v890_v44 = vrot.slane %v1983_v21, 2 }
 0x19c   :  { %v507_v41 = vadd.f32 %v2077_v18, %v502_v42  ;;  %v236_v25 = vadd.f32 %v234_v58, %v216_v23  ;;  %v666_v22 = vsel %vm183_vm10, %v664_v40, %v665_v15  ;;  %v1124_v18 = vsel %vm141_vm8, %v1122_v61, %v1123_v60 }
 0x19d   :  { %v832_v0 = vsel %vm183_vm10, %v830_v57, %v831_v53  ;;  %v355_v4 = vadd.f32 %v353_v1, %v341_v2  ;;  %v668_v10 = vadd.f32 %v666_v22, %v2073_v28  ;;  %v996_v43 = vpop.permute.xlu1 %995  ;;  %v393_v28 = vsel %vm183_vm10, %v1979_v9, %v392_v24 }
 0x19e   :  { %v521_v54 = vadd.f32 %v519_v39, %v507_v41  ;;  %v834_v3 = vadd.f32 %v832_v0, %v814_v8  ;;  %v1142_v26 = vpop.permute.xlu0 %1141  ;;  %249 = vrot.lane.b32.xlu0 %v236_v25, %s1601_s26  ;;  %v997_v38 = vrot.slane %v996_v43, 2  ;;  %v724_v39 = vrot.slane %v1996_v62, 2  ;;  %s1610_s26 = smov [#allocation10]  }
 0x19f   :  { %v1143_v59 = vrot.slane %v1142_v26, 2  ;;  %v673_v52 = vadd.f32 %v2080_v55, %v668_v10  ;;  %v375_v1 = vadd.f32 %v373_v29, %v355_v4  ;;  %v1126_v37 = vadd.f32 %v1124_v18, %v2069_v6  ;;  %s1367_s27 = sshll.u32 %s1610_s26, 4  ;;  %s1368_s27 = int_to_ptr.vmem [resolvable:$true] %s1367_s27 }
 0x1a0   :  { %v839_v14 = vadd.f32 %v2082_v7, %v834_v3  ;;  %v541_v33 = vadd.f32 %v539_v19, %v521_v54  ;;  %v998_v47 = vsel %vm183_vm10, %v996_v43, %v997_v38  ;;  %v1036_v7 = vrot.slane %v1964_v48, 2  ;;  %s1562_s28 = scalar_lea.vmem %s1368_s27, 256  ;;  %p1567_p11 = scmp.lt.s32.totalorder %s1368_s27, %s1368_s27 }
 0x1a1   :  { %v1144_v58 = vsel %vm162_vm9, %v1142_v26, %v1143_v59  ;;  %v687_v61 = vadd.f32 %v2105_v16, %v673_v52  ;;  %v1000_v55 = vadd.f32 %v998_v47, %v2097_v36  ;;  %v1162_v32 = vpop.permute.xlu1 %1161  ;;  %v395_v17 = vadd.f32 %v393_v28, %v375_v1  ;;  %p1563_p10 = scmp.ne.s32.totalorder %s1368_s27, %s1562_s28  ;;  %p1568_p12 = scmp.lt.s32.totalorder %s1562_s28, %s1562_s28 }
 0x1a2   :  { %v853_v50 = vadd.f32 %v851_v27, %v839_v14  ;;  %v1163_v29 = vrot.slane %v1162_v32, 2  ;;  %v561_v19 = vadd.f32 %v559_v5, %v541_v33  ;;  %v1146_v46 = vadd.f32 %v1144_v58, %v1126_v37 }
 0x1a3   :  { %v1005_v9 = vadd.f32 %v2085_v30, %v1000_v55  ;;  %v707_v35 = vadd.f32 %v705_v31, %v687_v61  ;;  %v891_v51 = vsel %vm183_vm10, %v1983_v21, %v890_v44  ;;  %v725_v6 = vsel %vm183_vm10, %v1996_v62, %v724_v39  ;;  %p1569_p13 = por %p1568_p12, %p1567_p11 }
 0x1a4   :  { %v873_v49 = vadd.f32 %v871_v20, %v853_v50  ;;  %v1056_v16 = vrot.slane %v2009_v45, 2  ;;  %v1164_v36 = vsel %vm183_vm10, %v1162_v32, %v1163_v29  ;;  %v1037_v30 = vsel %vm162_vm9, %v1964_v48, %v1036_v7 }
 0x1a5   :  { %v1019_v27 = vadd.f32 %v2115_v13, %v1005_v9  ;;  %v1166_v12 = vadd.f32 %v1164_v36, %v1146_v46  ;;  %v727_v40 = vadd.f32 %v725_v6, %v707_v35  ;;  %v1202_v31 = vrot.slane %v2000_v63, 2  ;;  %p1570_p0 = pnand %p1569_p13, %p1563_p10 }
 0x1a6   :  { %v893_v42 = vadd.f32 %v891_v51, %v873_v49  ;;  %v1183_v62 = vsel %vm141_vm8, %v1945_v11, %v1182_v56  ;;  %v1057_v57 = vsel %vm183_vm10, %v2009_v45, %v1056_v16  ;;  %v1602_v53 = vmov 1983009808  }
 0x1a7   :  { %v1171_v20 = vadd.f32 %v2088_v34, %v1166_v12  ;;  %v1039_v21 = vadd.f32 %v1037_v30, %v1019_v27  ;;  %v1203_v13 = vsel %vm162_vm9, %v2000_v63, %v1202_v31  ;;  %v269_v8 = vunpack.c.l.s4 %v1602_v53  ;;  %v2298_v34 = vld [vmem:[#allocation15_spill] sm:$0xff] }
 0x1a9   :  { %v1185_v23 = vadd.f32 %v1183_v62, %v1171_v20  ;;  %v1059_v60 = vadd.f32 %v1057_v57, %v1039_v21  ;;  %v270_v48 = vunpack.c.0.s8 %v269_v8  ;;  %v127_v20 = vld [vmem:[#allocation2] sm:$0xf]  ;;  %v128_v21 = vstv %s126_s25 }
 0x1ab   :  { %v1205_v15 = vadd.f32 %v1203_v13, %v1185_v23  ;;  %v2179_v25 = vsub.s32 %v270_v48, %v2298_v34  ;;  %v129_v23 = vmul.f32 %v128_v21, %v127_v20 }
 0x1d8   :  { %v566_v2 = vpop.permute.xlu0 %565 }
 0x1d9   :  { %v567_v41 = vrot.slane %v566_v2, 2 }
 0x1db   :  { %v568_v11 = vsel %vm252_vm11, %v566_v2, %v567_v41  ;;  %v400_v5 = vpop.permute.xlu1 %399 }
 0x1dc   :  { %v570_v56 = vadd.f32 %v568_v11, %v561_v19  ;;  %v898_v45 = vpop.permute.xlu0 %897  ;;  %v401_v24 = vrot.slane %v400_v5, 2  ;;  %v189_v11 = vstv %s1387_s2 }
 0x1dd   :  { %v899_v22 = vrot.slane %v898_v45, 2 }
 0x1de   :  { %v583_v0 = vcombine.high %v570_v56, %v570_v56  ;;  %v590_v63 = vrot.slane %v570_v56, %v2179_v25  ;;  %v402_v4 = vsel %vm252_vm11, %v400_v5, %v401_v24  ;;  %v188_v56 = vld [vmem:[#allocation2 + $0x6] sm:$0xf] }
 0x1df   :  { %v900_v54 = vsel %vm252_vm11, %v898_v45, %v899_v22  ;;  %v404_v10 = vadd.f32 %v402_v4, %v395_v17  ;;  %v732_v43 = vpop.permute.xlu1 %731 }
 0x1e0   :  { %v902_v3 = vadd.f32 %v900_v54, %v893_v42  ;;  %v1221_v26 = vpop.permute.xlu0 %1220  ;;  %599 = vrot.lane.b32.xlu0 %v590_v63, %s1603_s18  ;;  %v597_v44 = vrot.slane %v583_v0, %v2179_v25  ;;  %v733_v18 = vrot.slane %v732_v43, 2  ;;  %v598_v42 = vcombine.high %v590_v63, %v590_v63 }
 0x1e1   :  { %v417_v38 = vcombine.high %v404_v10, %v404_v10  ;;  %v424_v52 = vrot.slane %v404_v10, %v2179_v25  ;;  %v1222_v1 = vrot.slane %v1221_v26, 2  ;;  %v190_v0 = vmul.f32 %v189_v11, %v188_v56 }
 0x1e2   :  { %v915_v59 = vcombine.high %v902_v3, %v902_v3  ;;  %v922_v14 = vrot.slane %v902_v3, %v2179_v25  ;;  %v734_v33 = vsel %vm252_vm11, %v732_v43, %v733_v18 }
 0x1e3   :  { %v736_v28 = vadd.f32 %v734_v33, %v727_v40  ;;  %v1064_v39 = vpop.permute.xlu1 %1063  ;;  %433 = vrot.lane.b32.xlu1 %v424_v52, %s1604_s20  ;;  %v431_v47 = vrot.slane %v417_v38, %v2179_v25  ;;  %v1223_v55 = vsel %vm183_vm10, %v1221_v26, %v1222_v1  ;;  %v432_v40 = vcombine.high %v424_v52, %v424_v52  ;;  %v247_v1 = vld [vmem:[#allocation7] ss:$8 sm:$0x3] }
 0x1e4   :  { %931 = vrot.lane.b32.xlu0 %v922_v14, %s1605_s21  ;;  %v1065_v58 = vrot.slane %v1064_v39, 2  ;;  %v929_v50 = vrot.slane %v915_v59, %v2179_v25  ;;  %v1225_v9 = vadd.f32 %v1223_v55, %v1205_v15  ;;  %v139_v12 = vpop.permute.xlu0 %138  ;;  %v930_v13 = vcombine.high %v922_v14, %v922_v14 }
 0x1e5   :  { %v749_v37 = vcombine.high %v736_v28, %v736_v28  ;;  %v756_v61 = vrot.slane %v736_v28, %v2179_v25  ;;  %v140_v31 = vrot.slane %v139_v12, 2  ;;  %v2224_v59 = vsub.s32 0, %v2298_v34 }
 0x1e6   :  { %v1066_v32 = vsel %vm252_vm11, %v1064_v39, %v1065_v58  ;;  %v2228_v28 = vsub.s32 1, %v2298_v34 }
 0x1e7   :  { %v1068_v7 = vadd.f32 %v1066_v32, %v1059_v60  ;;  %v1230_v29 = vpop.permute.xlu1 %1229  ;;  %765 = vrot.lane.b32.xlu1 %v756_v61, %s1606_s22  ;;  %v763_v19 = vrot.slane %v749_v37, %v2179_v25  ;;  %v142_v57 = vsel %vm141_vm8, %v139_v12, %v140_v31  ;;  %v764_v15 = vcombine.high %v756_v61, %v756_v61  ;;  %v729_v31 = vld [vmem:[#allocation7 + $0x3] ss:$8 sm:$0x3] }
 0x1e8   :  { %v1231_v17 = vrot.slane %v1230_v29, 2  ;;  %v181_v60 = vpop.permute.xlu0 %180  ;;  %v144_v8 = vadd.f32 %v142_v57, %v129_v23  ;;  %v260_v37 = vrot.slane %v247_v1, %v2224_v59 }
 0x1e9   :  { %v1081_v46 = vcombine.high %v1068_v7, %v1068_v7  ;;  %v1088_v49 = vrot.slane %v1068_v7, %v2179_v25  ;;  %v182_v48 = vrot.slane %v181_v60, 2 }
 0x1ea   :  { %v1232_v35 = vsel %vm252_vm11, %v1230_v29, %v1231_v17 }
 0x1eb   :  { %v1234_v51 = vadd.f32 %v1232_v35, %v1225_v9  ;;  %1097 = vrot.lane.b32.xlu1 %v1088_v49, %s1607_s24  ;;  %v1095_v6 = vrot.slane %v1081_v46, %v2179_v25  ;;  %v160_v30 = vpop.permute.xlu1 %159  ;;  %v184_v41 = vsel %vm183_vm10, %v181_v60, %v182_v48  ;;  %v1096_v22 = vcombine.high %v1088_v49, %v1088_v49  ;;  %v397_v49 = vld [vmem:[#allocation7 + $0x1] ss:$8 sm:$0x3] }
 0x1ec   :  { %v161_v62 = vrot.slane %v160_v30, 2  ;;  %v222_v4 = vpop.permute.xlu0 %221 }
 0x1ed   :  { %v1247_v16 = vcombine.high %v1234_v51, %v1234_v51  ;;  %v1254_v36 = vrot.slane %v1234_v51, %v2179_v25  ;;  %v223_v10 = vrot.slane %v222_v4, 2 }
 0x1ee   :  { %v163_v53 = vsel %vm162_vm9, %v160_v30, %v161_v62 }
 0x1ef   :  { %437 = vrot.lane.b32.xlu1 %v431_v47, %s1604_s20  ;;  %1263 = vrot.lane.b32.xlu0 %v1254_v36, %s1608_s1  ;;  %v1261_v27 = vrot.slane %v1247_v16, %v2179_v25  ;;  %v165_v2 = vadd.f32 %v163_v53, %v144_v8  ;;  %v202_v45 = vpop.permute.xlu1 %201  ;;  %v1262_v24 = vcombine.high %v1254_v36, %v1254_v36 }
 0x1f0   :  { %v203_v63 = vrot.slane %v202_v45, 2  ;;  %v413_v16 = vrot.slane %v397_v49, %v2228_v28 }
 0x1f1   :  { %v186_v5 = vadd.f32 %v184_v41, %v165_v2 }
 0x1f2   :  { %v204_v3 = vsel %vm141_vm8, %v202_v45, %v203_v63  ;;  %v895_v45 = vld [vmem:[#allocation7 + $0x4] ss:$8 sm:$0x3] }
 0x1f3   :  { %601 = vrot.lane.b32.xlu1 %v598_v42, %s1603_s18  ;;  %435 = vrot.lane.b32.xlu0 %v432_v40, %s1604_s20  ;;  %v191_v54 = vadd.f32 %v190_v0, %v186_v5  ;;  %v242_v26 = vpop.permute.xlu1 %241  ;;  %v563_v42 = vld [vmem:[#allocation7 + $0x2] ss:$8 sm:$0x3]  ;;  %v1061_v0 = vld [vmem:[#allocation7 + $0x5] ss:$8 sm:$0x3] }
 0x1f4   :  { %v243_v18 = vrot.slane %v242_v26, 2  ;;  %v575_v23 = vrot.slane %v563_v42, %v2224_v59  ;;  %v579_v60 = vrot.slane %v563_v42, %v2228_v28 }
 0x1f5   :  { %v206_v43 = vadd.f32 %v204_v3, %v191_v54  ;;  %v907_v3 = vrot.slane %v895_v45, %v2224_v59 }
 0x1f6   :  { %v244_v14 = vsel %vm183_vm10, %v242_v26, %v243_v18  ;;  %v1073_v18 = vrot.slane %v1061_v0, %v2224_v59 }
 0x1f7   :  { %769 = vrot.lane.b32.xlu1 %v763_v19, %s1606_s22  ;;  %603 = vrot.lane.b32.xlu0 %v597_v44, %s1603_s18  ;;  %v224_v44 = vsel %vm162_vm9, %v222_v4, %v223_v10 }
 0x1f8   :  { %v226_v38 = vadd.f32 %v224_v44, %v206_v43  ;;  %v1227_v43 = vld [vmem:[#allocation7 + $0x6] ss:$8 sm:$0x3] }
 0x1fa   :  { %v246_v39 = vadd.f32 %v244_v14, %v226_v38  ;;  %v1077_v38 = vrot.slane %v1061_v0, %v2228_v28  ;;  %v911_v14 = vrot.slane %v895_v45, %v2228_v28  ;;  %v1355_v45 = vld [vmem:[#allocation8 + $0xb] ss:$4 sm:$0x3] }
 0x1fb   :  { %933 = vrot.lane.b32.xlu1 %v930_v13, %s1605_s21  ;;  %767 = vrot.lane.b32.xlu0 %v764_v15, %s1606_s22  ;;  %v741_v13 = vrot.slane %v729_v31, %v2224_v59  ;;  %v745_v15 = vrot.slane %v729_v31, %v2228_v28 }
 0x1ff   :  { %1101 = vrot.lane.b32.xlu1 %v1095_v6, %s1607_s24  ;;  %935 = vrot.lane.b32.xlu0 %v929_v50, %s1605_s21  ;;  %v264_v50 = vrot.slane %v247_v1, %v2228_v28  ;;  %v409_v6 = vrot.slane %v397_v49, %v2224_v59 }
 0x203   :  { %1265 = vrot.lane.b32.xlu1 %v1262_v24, %s1608_s1  ;;  %1099 = vrot.lane.b32.xlu0 %v1096_v22, %s1607_s24 }
 0x207   :  { %1267 = vrot.lane.b32.xlu0 %v1261_v27, %s1608_s1 }
 0x210   :  { %v250_v52 = vpop.permute.xlu0 %249 }
 0x211   :  { %v251_v33 = vrot.slane %v250_v52, 2 }
 0x213   :  { %v253_v47 = vsel %vm252_vm11, %v250_v52, %v251_v33  ;;  %v1239_v33 = vrot.slane %v1227_v43, %v2224_v59 }
 0x214   :  { %v255_v58 = vadd.f32 %v253_v47, %v246_v39 }
 0x216   :  { %v274_v61 = vrot.slane %v255_v58, %v2179_v25 }
 0x218   :  { %v275_v55 = vcombine.high %v274_v61, %v274_v61  ;;  %v278_v32 = vmul.f32 %v274_v61, %v260_v37 }
 0x21a   :  { %v279_v7 = vmul.f32 %v275_v55, %v264_v50 }
 0x252   :  { %v600_v19 = vpop.permute.xlu0 %599 }
 0x255   :  { %v434_v29 = vpop.permute.xlu1 %433 }
 0x256   :  { %v932_v9 = vpop.permute.xlu0 %931 }
 0x259   :  { %v766_v17 = vpop.permute.xlu1 %765 }
 0x25d   :  { %v1098_v46 = vpop.permute.xlu1 %1097 }
 0x261   :  { %v438_v35 = vpop.permute.xlu1 %437  ;;  %v1264_v51 = vpop.permute.xlu0 %1263 }
 0x265   :  { %v602_v36 = vpop.permute.xlu1 %601  ;;  %v436_v25 = vpop.permute.xlu0 %435 }
 0x266   :  { %v440_v27 = vsel %vm439_vm12, %v434_v29, %v436_v25  ;;  %v441_v12 = vsel %vm439_vm12, %v436_v25, %v438_v35  ;;  %v606_v53 = vsel %vm605_vm13, %v600_v19, %v602_v36 }
 0x267   :  { %v444_v40 = vmul.f32 %v440_v27, %v409_v6  ;;  %v445_v30 = vmul.f32 %v441_v12, %v413_v16  ;;  %v610_v56 = vmul.f32 %v606_v53, %v575_v23  ;;  %v1300_v23 = vld [vmem:[#allocation8] ss:$4 sm:$0x3]  ;;  %v1339_v53 = vld [vmem:[#allocation8 + $0x9] ss:$4 sm:$0x3] }
 0x269   :  { %v1276_v20 = vadd.f32 %v444_v40, %v278_v32  ;;  %v1277_v21 = vadd.f32 %v445_v30, %v279_v7  ;;  %v770_v62 = vpop.permute.xlu1 %769  ;;  %v604_v57 = vpop.permute.xlu0 %603  ;;  %v1243_v7 = vrot.slane %v1227_v43, %v2228_v28  ;;  %v1609_v40 = vmov 1966171168  }
 0x26a   :  { %v607_v8 = vsel %vm605_vm13, %v602_v36, %v604_v57  ;;  %v1306_v30 = vunpack.c.l.s4 %v1609_v40 }
 0x26b   :  { %v611_v5 = vmul.f32 %v607_v8, %v579_v60  ;;  %v1346_v8 = vld [vmem:[#allocation8 + $0x2] ss:$4 sm:$0x3] }
 0x26c   :  { %v1307_v31 = vunpack.c.0.s8 %v1306_v30 }
 0x26d   :  { %v934_v48 = vpop.permute.xlu1 %933  ;;  %v768_v2 = vpop.permute.xlu0 %767 }
 0x26e   :  { %v772_v41 = vsel %vm771_vm14, %v766_v17, %v768_v2  ;;  %v773_v11 = vsel %vm771_vm14, %v768_v2, %v770_v62  ;;  %v938_v52 = vsel %vm937_vm15, %v932_v9, %v934_v48 }
 0x26f   :  { %v776_v24 = vmul.f32 %v772_v41, %v741_v13  ;;  %v777_v22 = vmul.f32 %v773_v11, %v745_v15  ;;  %v942_v50 = vmul.f32 %v938_v52, %v907_v3  ;;  %v1338_v13 = vld [vmem:[#allocation8 + $0x1] ss:$4 sm:$0x3]  ;;  %v1301_v15 = vld [vmem:[#allocation8 + $0x8] ss:$4 sm:$0x3] }
 0x270   :  { %v1347_v41 = vld [vmem:[#allocation8 + $0xa] ss:$4 sm:$0x3]  ;;  %v1354_v11 = vld [vmem:[#allocation8 + $0x3] ss:$4 sm:$0x3] }
 0x271   :  { %v1278_v63 = vadd.f32 %v776_v24, %v610_v56  ;;  %v1279_v4 = vadd.f32 %v777_v22, %v611_v5  ;;  %v1102_v54 = vpop.permute.xlu1 %1101  ;;  %v936_v10 = vpop.permute.xlu0 %935  ;;  %v2299_v56 = vlaneseq }
 0x272   :  { %v939_v47 = vsel %vm937_vm15, %v934_v48, %v936_v10 }
 0x273   :  { %v1282_v26 = vadd.f32 %v1278_v63, %v1276_v20  ;;  %v1283_v44 = vadd.f32 %v1279_v4, %v1277_v21  ;;  %v943_v29 = vmul.f32 %v939_v47, %v911_v14  ;;  %v1310_v21 = vsub.s32 %v1307_v31, %v2298_v34 }
 0x274   :  { %vm2252_vm2 = vcmp.lt.s32.totalorder %v2299_v56, 256 }
 0x275   :  { %v1266_v1 = vpop.permute.xlu1 %1265  ;;  %v1100_v39 = vpop.permute.xlu0 %1099 }
 0x276   :  { %v1270_v58 = vsel %vm1269_vm0, %v1264_v51, %v1266_v1  ;;  %v1104_v37 = vsel %vm1103_vm1, %v1098_v46, %v1100_v39  ;;  %v1105_v61 = vsel %vm1103_vm1, %v1100_v39, %v1102_v54 }
 0x277   :  { %v1108_v55 = vmul.f32 %v1104_v37, %v1073_v18  ;;  %v1109_v32 = vmul.f32 %v1105_v61, %v1077_v38  ;;  %v1274_v19 = vmul.f32 %v1270_v58, %v1239_v33 }
 0x279   :  { %v1280_v17 = vadd.f32 %v1108_v55, %v942_v50  ;;  %v1268_v9 = vpop.permute.xlu0 %1267  ;;  %v1281_v59 = vadd.f32 %v1109_v32, %v943_v29 }
 0x27a   :  { %v1271_v49 = vsel %vm1269_vm0, %v1266_v1, %v1268_v9 }
 0x27b   :  { %v1284_v35 = vadd.f32 %v1280_v17, %v1274_v19  ;;  %v1275_v6 = vmul.f32 %v1271_v49, %v1243_v7 }
 0x27d   :  { %v1286_v16 = vadd.f32 %v1284_v35, %v1282_v26  ;;  %v1285_v36 = vadd.f32 %v1281_v59, %v1275_v6 }
 0x27f   :  { %v1478_v25 = vmul.f32 -1.442695, %v1286_v16  ;;  %v1287_v51 = vadd.f32 %v1285_v36, %v1283_v44 }
 0x281   :  { %1501 = vpow2.f32 %v1478_v25  ;;  %v1479_v46 = vmul.f32 -1.442695, %v1287_v51 }
 0x283   :  { %1503 = vpow2.f32 %v1479_v46 }
 0x28e   :  { %v1502_v27 = vpop.eup %1501 }
 0x28f   :  { %v1294_v12 = vadd.f32 1.0, %v1502_v27 }
 0x290   :  { %v1504_v42 = vpop.eup %1503 }
 0x291   :  { %v1295_v28 = vadd.f32 1.0, %v1504_v42  ;;  %1505 = vrcp.f32 %v1294_v12 }
 0x293   :  { %1507 = vrcp.f32 %v1295_v28 }
 0x29e   :  { %v1506_v20 = vpop.eup %1505 }
 0x2a0   :  { %v1508_v62 = vpop.eup %1507 }
 0x2a1   :  { %v1304_v57 = vcombine.low %v1506_v20, %v1508_v62 }
 0x2a3   :  { %v1311_v60 = vrot.slane %v1304_v57, %v1310_v21 }
 0x2a5   :  { %v1312_v48 = vcombine.high %v1311_v60, %v1311_v60  ;;  %v1319_v2 = vrot.slane %v1311_v60, %v1310_v21 }
 0x2a7   :  { %v1326_v34 = vrot.slane %v1312_v48, %v1310_v21  ;;  %v1329_v24 = vmul.f32 %v1319_v2, %v1300_v23  ;;  %v1340_v22 = vmul.f32 %v1338_v13, %v1319_v2  ;;  %v1348_v0 = vmul.f32 %v1346_v8, %v1319_v2 }
 0x2a8   :  { %v1356_v63 = vmul.f32 %v1354_v11, %v1319_v2 }
 0x2a9   :  { %v1330_v4 = vmul.f32 %v1326_v34, %v1301_v15  ;;  %1335 = vst.msk [vmem:[#allocation10] ss:$4 sm:$0x3] %vm2252_vm2, %v1329_v24  ;;  %v1341_v54 = vmul.f32 %v1339_v53, %v1326_v34  ;;  %1343 = vst.msk [vmem:[#allocation10 + $0x1] ss:$4 sm:$0x3] %vm2252_vm2, %v1340_v22  ;;  %v1349_v10 = vmul.f32 %v1347_v41, %v1326_v34 }
 0x2aa   :  { %1351 = vst.msk [vmem:[#allocation10 + $0x2] ss:$4 sm:$0x3] %vm2252_vm2, %v1348_v0  ;;  %v1357_v3 = vmul.f32 %v1355_v45, %v1326_v34  ;;  %1359 = vst.msk [vmem:[#allocation10 + $0x3] ss:$4 sm:$0x3] %vm2252_vm2, %v1356_v63 }
 0x2ab   :  { %1337 = vst.msk [vmem:[#allocation10 + $0x8] ss:$4 sm:$0x3] %vm2252_vm2, %v1330_v4  ;;  %1345 = vst.msk [vmem:[#allocation10 + $0x9] ss:$4 sm:$0x3] %vm2252_vm2, %v1341_v54 }
 0x2ac   :  { %1353 = vst.msk [vmem:[#allocation10 + $0xa] ss:$4 sm:$0x3] %vm2252_vm2, %v1349_v10  ;;  %1361 = vst.msk [vmem:[#allocation10 + $0xb] ss:$4 sm:$0x3] %vm2252_vm2, %v1357_v3 }
 0x2ad   :  { %1573 = shalt.err (!%p1570_p0)
}
 0x2ae   :  { %1373 = dma.vmem_to_hbm [thread:$0]  %s1368_s27, 256, %s2281_s3, [#allocation5], %s1593_s0, %s1593_s0, %s1594_s23  }
 0x2af   :  { %1588 = dma.done.wait [#allocation5], 256  }
 0x2b0   :  { %1589 = vsyncadd [#allocation5], 4294967040 }
 0x2b1   :  { %1377 = vsyncpa [#allocation4], 1 }
 0x2b2   :  { %1378 = vsyncpa [#allocation9], 1 }
 0x2b3   :  { %1379 = vsyncpa [#allocation5], 1 }
 0x2b4   :  { %1380 = vsyncpa [#allocation6], 1 }

</bundles_post_ra>
